<compile_context>
chip_gen: v7x
topology: tpu7x:2x2x1
jax: 0.10.0
libtpu: 0.0.40
codegen_flags: <defaults>
</compile_context>

<pallas_src>
import functools

import jax
import jax.numpy as jnp
from jax import lax
from jax.experimental import pallas as pl
from jax.experimental.pallas import tpu as pltpu


# --------------------------- fused forward kernel ---------------------------

def _lenet_kernel(x1_ref, w1_ref, b1_ref, rp1_ref, w2_ref, b2_ref, sel_ref,
                  wf1_ref, bf1_ref, wf2_ref, bf2_ref, wf3_ref, bf3_ref,
                  out_ref):
    f32 = jnp.float32

    def mm(a, b):
        return jnp.dot(a, b, preferred_element_type=f32)

    def sig(v):
        # exact sigmoid: exp on EUP + exact reciprocal (accuracy feedback).
        return pl.reciprocal(1.0 + jnp.exp(-v), approx=False)

    R = rp1_ref.shape[0]                 # batch * 14

    # ---- conv1 (5x5, pad=2) + sigmoid: ONE K=160 matmul ---------------------
    # rows = n*28 + oh, cols = ow*6 + cout (168).
    h1 = sig(mm(x1_ref[...], w1_ref[...]) + b1_ref[...])        # (N*28, 168)

    # ---- pool1 rows (H) via batch-block-diag matrix; W-pool folded into w2 --
    p1 = mm(rp1_ref[...], h1)                                   # (N*14, 168)

    # ---- conv2 (5x5, valid) + sigmoid: ONE K=840 matmul ---------------------
    # slab[v, i*168+col] = p1[v+i, col]; valid output rows are v = n*14 + oh2.
    s2 = jnp.concatenate([p1[i:i + R - 4, :] for i in range(5)], axis=1)
    h2 = sig(mm(s2, w2_ref[...]) + b2_ref[...])                 # (N*14-4, 160)

    # ---- fc1 (pool2 H+W and NCHW flatten folded into wf1) ------------------
    # f_in[u, r*160+k] = h2[u+r, k]; valid sample rows are u = n*14.
    L = R - 13
    f_in = jnp.concatenate([h2[r:r + L, :] for r in range(10)], axis=1)
    f_sel = mm(sel_ref[...], f_in)                              # (N, 1600)
    # TODO(synk): the original forward applies `sig(conv3(x))` to this 2-D
    # (N, 120) tensor, which is invalid for nn.Conv2d; conv3 is skipped and
    # only the sigmoid is kept (matches the pure-JAX reference below).
    f1 = sig(mm(f_sel, wf1_ref[...]) + bf1_ref[...])            # (N, 120)

    # ---- fc2, fc3 (fc3 padded to 128 lanes -> single lane-dense HBM store) --
    f2 = mm(f1, wf2_ref[...]) + bf2_ref[...]                    # (N, 84)
    out_ref[...] = mm(f2, wf3_ref[...]) + bf3_ref[...]          # (N, 128)


# --------------------------- host-side weight packing -----------------------

def prepare_kernel_params(p):
    """One-time packing of PyTorch-layout weights into kernel matmul operands."""
    f32 = jnp.float32
    w1, b1 = p["conv1_w"].astype(f32), p["conv1_b"].astype(f32)
    w2, b2 = p["conv2_w"].astype(f32), p["conv2_b"].astype(f32)

    # conv1 banded blocks, K-concatenated:
    #   w1cat[i*32 + t, ow*6 + co] = w1[co, 0, i, t - ow]  (if 0 <= t-ow < 5)
    eye28 = jnp.eye(28, dtype=f32)
    w1cat = []
    for i in range(5):
        e = jnp.zeros((32, 168), f32)
        for j in range(5):
            e = e.at[j:j + 28, :].add(jnp.kron(eye28, w1[:, 0, i, j].reshape(1, 6)))
        w1cat.append(e)
    w1cat = jnp.concatenate(w1cat, axis=0)                       # (160, 168)

    # pool1 column(W)-pool matrix, folded into the conv2 weight below.
    c1 = jnp.kron(jnp.kron(jnp.eye(14, dtype=f32), 0.5 * jnp.ones((2, 1), f32)),
                  jnp.eye(6, dtype=f32))                         # (168, 84)

    # conv2 banded blocks with c1 folded, K-concatenated:
    #   w2cat[i*168 + wf*6 + ci, ow*16 + co] = 0.5 * w2[co, ci, i, wf//2 - ow]
    eye10 = jnp.eye(10, dtype=f32)
    w2cat = []
    for i in range(5):
        e = jnp.zeros((84, 160), f32)
        for j in range(5):
            e = e.at[j * 6:j * 6 + 60, :].add(jnp.kron(eye10, w2[:, :, i, j].T))
        w2cat.append(c1 @ e)                                     # (168, 160)
    w2cat = jnp.concatenate(w2cat, axis=0)                       # (840, 160)

    # per-sample H-pool for pool1 (block-diagonalised over batch in wrapper).
    r1 = jnp.kron(jnp.eye(14, dtype=f32), 0.5 * jnp.ones((1, 2), f32))  # (14, 28)

    # fc1 weight with pool2 (2x2 avg over H and W) and the PyTorch (c, h, w)
    # flatten order folded in:
    #   wf1[r*160 + w*16 + c, f] = 0.25 * fc1_w[f, c*25 + (r//2)*5 + (w//2)]
    r = jnp.arange(10)
    w = jnp.arange(10)
    c = jnp.arange(16)
    idx = (c[None, None, :] * 25 + (r[:, None, None] // 2) * 5
           + (w[None, :, None] // 2)).reshape(-1)                # (1600,)
    wf1 = 0.25 * p["fc1_w"].astype(f32)[:, idx].T                # (1600, 120)

    wf3 = jnp.zeros((84, 128), f32).at[:, :10].set(p["fc3_w"].astype(f32).T)
    bf3 = jnp.zeros((1, 128), f32).at[0, :10].set(p["fc3_b"].astype(f32))

    return dict(
        w1=w1cat, b1=jnp.tile(b1, 28).reshape(1, 168),
        r1=r1,
        w2=w2cat, b2=jnp.tile(b2, 10).reshape(1, 160),
        wf1=wf1, bf1=p["fc1_b"].astype(f32).reshape(1, 120),
        wf2=p["fc2_w"].astype(f32).T, bf2=p["fc2_b"].astype(f32).reshape(1, 84),
        wf3=wf3, bf3=bf3,
    )


# ------------------------------- forward wrapper ----------------------------

@jax.jit
def net_forward(kp, x):
    n = x.shape[0]
    assert x.shape[1:] == (1, 28, 28)
    f32 = jnp.float32

    # Cin == 1: NCHW -> padded (N, 32, 32), then host-side K-concatenation of
    # the 5 kernel-row shifts into a lane-dense (N*28, 160) conv1 input slab.
    xpad = jnp.pad(x.astype(f32), ((0, 0), (0, 0), (2, 2), (2, 2))).reshape(n, 32, 32)
    x1 = jnp.concatenate([xpad[:, i:i + 28, :] for i in range(5)],
                         axis=2).reshape(n * 28, 160)

    # Batch-block-diagonal pool1 H-pool and the fc1 valid-row selector.
    # (constant subgraphs: XLA folds them at compile time.)
    rp1 = jnp.kron(jnp.eye(n, dtype=f32), kp["r1"])              # (n*14, n*28)
    sel = jnp.zeros((n, n * 14 - 13), f32).at[
        jnp.arange(n), jnp.arange(n) * 14].set(1.0)              # (n, n*14-13)

    vmem = pl.BlockSpec(memory_space=pltpu.MemorySpace.VMEM)
    out = pl.pallas_call(
        _lenet_kernel,
        out_shape=jax.ShapeDtypeStruct((n, 128), jnp.float32),
        in_specs=[vmem] * 13,
        out_specs=vmem,
    )(x1, kp["w1"], kp["b1"], rp1, kp["w2"], kp["b2"], sel,
      kp["wf1"], kp["bf1"], kp["wf2"], kp["bf2"], kp["wf3"], kp["bf3"])
    return out[:, :10]


# ------------------------------- parameters ---------------------------------

def init_params(key):
    """Deterministic PyTorch-style U(-1/sqrt(fan_in), +1/sqrt(fan_in)) init."""
    def u(k, shape, fan_in):
        bound = 1.0 / jnp.sqrt(jnp.float32(fan_in))
        return jax.random.uniform(k, shape, jnp.float32, -bound, bound)

    ks = jax.random.split(key, 10)
    return {
        "conv1_w": u(ks[0], (6, 1, 5, 5), 25),
        "conv1_b": u(ks[1], (6,), 25),
        "conv2_w": u(ks[2], (16, 6, 5, 5), 150),
        "conv2_b": u(ks[3], (16,), 150),
        # conv3 (120,16,5,5) exists in __init__ but its use in forward() is
        # invalid (Conv2d on a 2-D tensor); weights intentionally not created.
        "fc1_w": u(ks[4], (120, 400), 400),
        "fc1_b": u(ks[5], (120,), 400),
        "fc2_w": u(ks[6], (84, 120), 120),
        "fc2_b": u(ks[7], (84,), 120),
        "fc3_w": u(ks[8], (10, 84), 84),
        "fc3_b": u(ks[9], (10,), 84),
    }


# ----------------------------- pure-JAX reference ---------------------------

def reference_forward(params, x):
    hp = lax.Precision.HIGHEST

    def sigmoid(v):
        return 1.0 / (1.0 + jnp.exp(-v))

    def conv(v, w, b, pad):
        out = lax.conv_general_dilated(
            v, w, window_strides=(1, 1), padding=[(pad, pad), (pad, pad)],
            dimension_numbers=("NCHW", "OIHW", "NCHW"), precision=hp)
        return out + b.reshape(1, -1, 1, 1)

    def pool(v):
        n, c, h, w = v.shape
        return v.reshape(n, c, h // 2, 2, w // 2, 2).mean(axis=(3, 5))

    h = sigmoid(conv(x, params["conv1_w"], params["conv1_b"], 2))
    h = pool(h)
    h = sigmoid(conv(h, params["conv2_w"], params["conv2_b"], 0))
    h = pool(h)
    h = h.reshape(h.shape[0], -1)                 # PyTorch flatten (c, h, w)
    h = sigmoid(jnp.dot(h, params["fc1_w"].T, precision=hp) + params["fc1_b"])
    h = jnp.dot(h, params["fc2_w"].T, precision=hp) + params["fc2_b"]
    h = jnp.dot(h, params["fc3_w"].T, precision=hp) + params["fc3_b"]
    return h


if __name__ == "__main__":
    key = jax.random.PRNGKey(0)
    pkey, xkey = jax.random.split(key)
    params = init_params(pkey)
    kparams = prepare_kernel_params(params)       # one-time weight packing
    # fc1 in_features=400 forces the classic LeNet input size 1x28x28.
    x = jax.random.normal(xkey, (2, 1, 28, 28), jnp.float32)

    out = jax.block_until_ready(net_forward(kparams, x))
    assert out.shape == (2, 10) and out.dtype == jnp.float32

    ref = jax.block_until_ready(jax.jit(reference_forward)(params, x))
    max_err = float(jnp.max(jnp.abs(out - ref)))
    assert max_err < 5e-2, f"kernel/reference mismatch: {max_err}"
    print("KERNEL_OK")
</pallas_src>

<mosaic_0001>
module attributes {stable_mosaic.version = 11 : i64} {
  func.func @_lenet_kernel(%arg0: memref<56x160xf32, #tpu.memory_space<vmem>>, %arg1: memref<160x168xf32, #tpu.memory_space<vmem>>, %arg2: memref<1x168xf32, #tpu.memory_space<vmem>>, %arg3: memref<28x56xf32, #tpu.memory_space<vmem>>, %arg4: memref<840x160xf32, #tpu.memory_space<vmem>>, %arg5: memref<1x160xf32, #tpu.memory_space<vmem>>, %arg6: memref<2x15xf32, #tpu.memory_space<vmem>>, %arg7: memref<1600x120xf32, #tpu.memory_space<vmem>>, %arg8: memref<1x120xf32, #tpu.memory_space<vmem>>, %arg9: memref<120x84xf32, #tpu.memory_space<vmem>>, %arg10: memref<1x84xf32, #tpu.memory_space<vmem>>, %arg11: memref<84x128xf32, #tpu.memory_space<vmem>>, %arg12: memref<1x128xf32, #tpu.memory_space<vmem>>, %arg13: memref<2x128xf32, #tpu.memory_space<vmem>>) attributes {dimension_semantics = [], scalar_prefetch = 0 : i64, scratch_operands = 0 : i64, tpu.core_type = #tpu.core_type<tc>} {
    %c0 = arith.constant 0 : index
    %c0_0 = arith.constant 0 : index
    %0 = vector.load %arg0[%c0, %c0_0] : memref<56x160xf32, #tpu.memory_space<vmem>>, vector<56x160xf32>
    %c0_1 = arith.constant 0 : index
    %c0_2 = arith.constant 0 : index
    %1 = vector.load %arg1[%c0_1, %c0_2] : memref<160x168xf32, #tpu.memory_space<vmem>>, vector<160x168xf32>
    %cst = arith.constant dense<0.000000e+00> : vector<56x168xf32>
    %2 = tpu.matmul %0, %1, %cst {dimension_numbers = #tpu.dot_dimension_numbers<[1], [0], [0], [1], [0, 0, 1, 1], [], []>} : vector<56x160xf32>, vector<160x168xf32>, vector<56x168xf32> -> vector<56x168xf32>
    %c0_3 = arith.constant 0 : index
    %c0_4 = arith.constant 0 : index
    %3 = vector.load %arg2[%c0_3, %c0_4] : memref<1x168xf32, #tpu.memory_space<vmem>>, vector<1x168xf32>
    %4 = vector.broadcast %3 : vector<1x168xf32> to vector<56x168xf32>
    %5 = arith.addf %2, %4 : vector<56x168xf32>
    %cst_5 = arith.constant 0.000000e+00 : f32
    %6 = vector.broadcast %cst_5 : f32 to vector<56x168xf32>
    %7 = arith.subf %6, %5 : vector<56x168xf32>
    %8 = math.exp %7 : vector<56x168xf32>
    %cst_6 = arith.constant 1.000000e+00 : f32
    %9 = vector.broadcast %cst_6 : f32 to vector<56x168xf32>
    %10 = arith.addf %9, %8 : vector<56x168xf32>
    %11 = tpu.reciprocal %10 : vector<56x168xf32> -> vector<56x168xf32>
    %c0_7 = arith.constant 0 : index
    %c0_8 = arith.constant 0 : index
    %12 = vector.load %arg3[%c0_7, %c0_8] : memref<28x56xf32, #tpu.memory_space<vmem>>, vector<28x56xf32>
    %cst_9 = arith.constant dense<0.000000e+00> : vector<28x168xf32>
    %13 = tpu.matmul %12, %11, %cst_9 {dimension_numbers = #tpu.dot_dimension_numbers<[1], [0], [0], [1], [0, 0, 1, 1], [], []>} : vector<28x56xf32>, vector<56x168xf32>, vector<28x168xf32> -> vector<28x168xf32>
    %14 = vector.extract_strided_slice %13 {offsets = [0, 0], sizes = [24, 168], strides = [1, 1]} : vector<28x168xf32> to vector<24x168xf32>
    %15 = vector.extract_strided_slice %13 {offsets = [1, 0], sizes = [24, 168], strides = [1, 1]} : vector<28x168xf32> to vector<24x168xf32>
    %16 = vector.extract_strided_slice %13 {offsets = [2, 0], sizes = [24, 168], strides = [1, 1]} : vector<28x168xf32> to vector<24x168xf32>
    %17 = vector.extract_strided_slice %13 {offsets = [3, 0], sizes = [24, 168], strides = [1, 1]} : vector<28x168xf32> to vector<24x168xf32>
    %18 = vector.extract_strided_slice %13 {offsets = [4, 0], sizes = [24, 168], strides = [1, 1]} : vector<28x168xf32> to vector<24x168xf32>
    %19 = tpu.concatenate %14, %15, %16, %17, %18 in 1 : vector<24x168xf32>, vector<24x168xf32>, vector<24x168xf32>, vector<24x168xf32>, vector<24x168xf32> -> vector<24x840xf32>
    %c0_10 = arith.constant 0 : index
    %c0_11 = arith.constant 0 : index
    %20 = vector.load %arg4[%c0_10, %c0_11] : memref<840x160xf32, #tpu.memory_space<vmem>>, vector<840x160xf32>
    %cst_12 = arith.constant dense<0.000000e+00> : vector<24x160xf32>
    %21 = tpu.matmul %19, %20, %cst_12 {dimension_numbers = #tpu.dot_dimension_numbers<[1], [0], [0], [1], [0, 0, 1, 1], [], []>} : vector<24x840xf32>, vector<840x160xf32>, vector<24x160xf32> -> vector<24x160xf32>
    %c0_13 = arith.constant 0 : index
    %c0_14 = arith.constant 0 : index
    %22 = vector.load %arg5[%c0_13, %c0_14] : memref<1x160xf32, #tpu.memory_space<vmem>>, vector<1x160xf32>
    %23 = vector.broadcast %22 : vector<1x160xf32> to vector<24x160xf32>
    %24 = arith.addf %21, %23 : vector<24x160xf32>
    %cst_15 = arith.constant 0.000000e+00 : f32
    %25 = vector.broadcast %cst_15 : f32 to vector<24x160xf32>
    %26 = arith.subf %25, %24 : vector<24x160xf32>
    %27 = math.exp %26 : vector<24x160xf32>
    %cst_16 = arith.constant 1.000000e+00 : f32
    %28 = vector.broadcast %cst_16 : f32 to vector<24x160xf32>
    %29 = arith.addf %28, %27 : vector<24x160xf32>
    %30 = tpu.reciprocal %29 : vector<24x160xf32> -> vector<24x160xf32>
    %31 = vector.extract_strided_slice %30 {offsets = [0, 0], sizes = [15, 160], strides = [1, 1]} : vector<24x160xf32> to vector<15x160xf32>
    %32 = vector.extract_strided_slice %30 {offsets = [1, 0], sizes = [15, 160], strides = [1, 1]} : vector<24x160xf32> to vector<15x160xf32>
    %33 = vector.extract_strided_slice %30 {offsets = [2, 0], sizes = [15, 160], strides = [1, 1]} : vector<24x160xf32> to vector<15x160xf32>
    %34 = vector.extract_strided_slice %30 {offsets = [3, 0], sizes = [15, 160], strides = [1, 1]} : vector<24x160xf32> to vector<15x160xf32>
    %35 = vector.extract_strided_slice %30 {offsets = [4, 0], sizes = [15, 160], strides = [1, 1]} : vector<24x160xf32> to vector<15x160xf32>
    %36 = vector.extract_strided_slice %30 {offsets = [5, 0], sizes = [15, 160], strides = [1, 1]} : vector<24x160xf32> to vector<15x160xf32>
    %37 = vector.extract_strided_slice %30 {offsets = [6, 0], sizes = [15, 160], strides = [1, 1]} : vector<24x160xf32> to vector<15x160xf32>
    %38 = vector.extract_strided_slice %30 {offsets = [7, 0], sizes = [15, 160], strides = [1, 1]} : vector<24x160xf32> to vector<15x160xf32>
    %39 = vector.extract_strided_slice %30 {offsets = [8, 0], sizes = [15, 160], strides = [1, 1]} : vector<24x160xf32> to vector<15x160xf32>
    %40 = vector.extract_strided_slice %30 {offsets = [9, 0], sizes = [15, 160], strides = [1, 1]} : vector<24x160xf32> to vector<15x160xf32>
    %41 = tpu.concatenate %31, %32, %33, %34, %35, %36, %37, %38, %39, %40 in 1 : vector<15x160xf32>, vector<15x160xf32>, vector<15x160xf32>, vector<15x160xf32>, vector<15x160xf32>, vector<15x160xf32>, vector<15x160xf32>, vector<15x160xf32>, vector<15x160xf32>, vector<15x160xf32> -> vector<15x1600xf32>
    %c0_17 = arith.constant 0 : index
    %c0_18 = arith.constant 0 : index
    %42 = vector.load %arg6[%c0_17, %c0_18] : memref<2x15xf32, #tpu.memory_space<vmem>>, vector<2x15xf32>
    %cst_19 = arith.constant dense<0.000000e+00> : vector<2x1600xf32>
    %43 = tpu.matmul %42, %41, %cst_19 {dimension_numbers = #tpu.dot_dimension_numbers<[1], [0], [0], [1], [0, 0, 1, 1], [], []>} : vector<2x15xf32>, vector<15x1600xf32>, vector<2x1600xf32> -> vector<2x1600xf32>
    %c0_20 = arith.constant 0 : index
    %c0_21 = arith.constant 0 : index
    %44 = vector.load %arg7[%c0_20, %c0_21] : memref<1600x120xf32, #tpu.memory_space<vmem>>, vector<1600x120xf32>
    %cst_22 = arith.constant dense<0.000000e+00> : vector<2x120xf32>
    %45 = tpu.matmul %43, %44, %cst_22 {dimension_numbers = #tpu.dot_dimension_numbers<[1], [0], [0], [1], [0, 0, 1, 1], [], []>} : vector<2x1600xf32>, vector<1600x120xf32>, vector<2x120xf32> -> vector<2x120xf32>
    %c0_23 = arith.constant 0 : index
    %c0_24 = arith.constant 0 : index
    %46 = vector.load %arg8[%c0_23, %c0_24] : memref<1x120xf32, #tpu.memory_space<vmem>>, vector<1x120xf32>
    %47 = vector.broadcast %46 : vector<1x120xf32> to vector<2x120xf32>
    %48 = arith.addf %45, %47 : vector<2x120xf32>
    %cst_25 = arith.constant 0.000000e+00 : f32
    %49 = vector.broadcast %cst_25 : f32 to vector<2x120xf32>
    %50 = arith.subf %49, %48 : vector<2x120xf32>
    %51 = math.exp %50 : vector<2x120xf32>
    %cst_26 = arith.constant 1.000000e+00 : f32
    %52 = vector.broadcast %cst_26 : f32 to vector<2x120xf32>
    %53 = arith.addf %52, %51 : vector<2x120xf32>
    %54 = tpu.reciprocal %53 : vector<2x120xf32> -> vector<2x120xf32>
    %c0_27 = arith.constant 0 : index
    %c0_28 = arith.constant 0 : index
    %55 = vector.load %arg9[%c0_27, %c0_28] : memref<120x84xf32, #tpu.memory_space<vmem>>, vector<120x84xf32>
    %cst_29 = arith.constant dense<0.000000e+00> : vector<2x84xf32>
    %56 = tpu.matmul %54, %55, %cst_29 {dimension_numbers = #tpu.dot_dimension_numbers<[1], [0], [0], [1], [0, 0, 1, 1], [], []>} : vector<2x120xf32>, vector<120x84xf32>, vector<2x84xf32> -> vector<2x84xf32>
    %c0_30 = arith.constant 0 : index
    %c0_31 = arith.constant 0 : index
    %57 = vector.load %arg10[%c0_30, %c0_31] : memref<1x84xf32, #tpu.memory_space<vmem>>, vector<1x84xf32>
    %58 = vector.broadcast %57 : vector<1x84xf32> to vector<2x84xf32>
    %59 = arith.addf %56, %58 : vector<2x84xf32>
    %c0_32 = arith.constant 0 : index
    %c0_33 = arith.constant 0 : index
    %60 = vector.load %arg11[%c0_32, %c0_33] : memref<84x128xf32, #tpu.memory_space<vmem>>, vector<84x128xf32>
    %cst_34 = arith.constant dense<0.000000e+00> : vector<2x128xf32>
    %61 = tpu.matmul %59, %60, %cst_34 {dimension_numbers = #tpu.dot_dimension_numbers<[1], [0], [0], [1], [0, 0, 1, 1], [], []>} : vector<2x84xf32>, vector<84x128xf32>, vector<2x128xf32> -> vector<2x128xf32>
    %c0_35 = arith.constant 0 : index
    %c0_36 = arith.constant 0 : index
    %62 = vector.load %arg12[%c0_35, %c0_36] : memref<1x128xf32, #tpu.memory_space<vmem>>, vector<1x128xf32>
    %63 = vector.broadcast %62 : vector<1x128xf32> to vector<2x128xf32>
    %64 = arith.addf %61, %63 : vector<2x128xf32>
    %c0_37 = arith.constant 0 : index
    %c0_38 = arith.constant 0 : index
    %65 = vector.load %arg13[%c0_37, %c0_38] : memref<2x128xf32, #tpu.memory_space<vmem>>, vector<2x128xf32>
    tpu.vector_store %arg13[%c0_37, %c0_38], %64 {strides = array<i32>} : memref<2x128xf32, #tpu.memory_space<vmem>>, vector<2x128xf32>,
    return
  }
}

</mosaic_0001>

<bundles_post_ra>
// kernel: net_forward.1
= control target key start
LH: loop header
LB: loop body
LE: loop exit
PB: predicated region body
PF: predicated region fallthrough
CT: control target
= control target key end

     0   :  { %vm111_vm0 = vcmask 261120   ;;  %s6007_s0 = inlined_call_operand.vmem [shape: f32[56,160], index: 0, kind: input, shape index: {}]   ;;  %s6008_s1 = inlined_call_operand.vmem [shape: f32[160,168], index: 1, kind: input, shape index: {}]   ;;  %s6009_s2 = inlined_call_operand.vmem [shape: f32[1,168], index: 2, kind: input, shape index: {}]   ;;  %s6010_s3 = inlined_call_operand.vmem [shape: f32[28,56], index: 3, kind: input, shape index: {}]   ;;  %s6011_s4 = inlined_call_operand.vmem [shape: f32[840,160], index: 4, kind: input, shape index: {}]   ;;  %s6012_s5 = inlined_call_operand.vmem [shape: f32[1,160], index: 5, kind: input, shape index: {}]   ;;  %s6013_s6 = inlined_call_operand.vmem [shape: f32[2,15], index: 6, kind: input, shape index: {}]   ;;  %s6014_s7 = inlined_call_operand.vmem [shape: f32[1600,120], index: 7, kind: input, shape index: {}]   ;;  %s6015_s8 = inlined_call_operand.vmem [shape: f32[1,120], index: 8, kind: input, shape index: {}]   ;;  %s6016_s9 = inlined_call_operand.vmem [shape: f32[120,84], index: 9, kind: input, shape index: {}]   ;;  %s6017_s10 = inlined_call_operand.vmem [shape: f32[1,84], index: 10, kind: input, shape index: {}]   ;;  %s6018_s11 = inlined_call_operand.vmem [shape: f32[84,128], index: 11, kind: input, shape index: {}]   ;;  %s6019_s12 = inlined_call_operand.vmem [shape: f32[1,128], index: 12, kind: input, shape index: {}]   ;;  %s6020_s13 = inlined_call_operand.hbm [shape: f32[2,128], index: 13, kind: output, shape index: {}]  }
   0x1   :  { %v60_v0 = vld [vmem:[%s6008_s1 + $0x8] sm:$0xff]  ;;  %v62_v1 = vld [vmem:[%s6008_s1 + $0x18] sm:$0xff]  ;;  %v59_v2 = vld [vmem:[%s6008_s1] sm:$0xff] }
   0x2   :  { %v3186_v3 = vpack.c.bf16 %v62_v1, %v60_v0  ;;  %v61_v4 = vld [vmem:[%s6008_s1 + $0x10] sm:$0xff]  ;;  %v64_v5 = vld [vmem:[%s6008_s1 + $0x28] sm:$0xff]  ;;  %v66_v6 = vld [vmem:[%s6008_s1 + $0x38] sm:$0xff] }
   0x3   :  { %v3188_v7 = vpack.c.bf16 %v61_v4, %v59_v2  ;;  %v3190_v8 = vpack.c.bf16 %v66_v6, %v64_v5  ;;  %v63_v9 = vld [vmem:[%s6008_s1 + $0x20] sm:$0xff]  ;;  %v65_v10 = vld [vmem:[%s6008_s1 + $0x30] sm:$0xff]  ;;  %v68_v11 = vld [vmem:[%s6008_s1 + $0x48] sm:$0xff] }
   0x4   :  { %3187 = vmatprep.subr.bf16.mxu0 %v3186_v3  ;;  %v70_v12 = vld [vmem:[%s6008_s1 + $0x58] sm:$0xff]  ;;  %v3192_v13 = vpack.c.bf16 %v65_v10, %v63_v9  ;;  %v67_v15 = vld [vmem:[%s6008_s1 + $0x40] sm:$0xff]  ;;  %v69_v16 = vld [vmem:[%s6008_s1 + $0x50] sm:$0xff] }
   0x5   :  { %3189 = vmatpush1.bf16.msra.mxu0 %v3188_v7  ;;  %v3194_v14 = vpack.c.bf16 %v70_v12, %v68_v11  ;;  %v72_v17 = vld [vmem:[%s6008_s1 + $0x68] sm:$0xff]  ;;  %v74_v18 = vld [vmem:[%s6008_s1 + $0x78] sm:$0xff]  ;;  %v3196_v19 = vpack.c.bf16 %v69_v16, %v67_v15  ;;  %v71_v21 = vld [vmem:[%s6008_s1 + $0x60] sm:$0xff] }
   0x6   :  { %3191 = vmatprep.subr.bf16.mxu0 %v3190_v8  ;;  %v3198_v20 = vpack.c.bf16 %v74_v18, %v72_v17  ;;  %v73_v22 = vld [vmem:[%s6008_s1 + $0x70] sm:$0xff]  ;;  %v76_v23 = vld [vmem:[%s6008_s1 + $0x88] sm:$0xff]  ;;  %v78_v24 = vld [vmem:[%s6008_s1 + $0x98] sm:$0xff] }
   0x7   :  { %v3200_v25 = vpack.c.bf16 %v73_v22, %v71_v21  ;;  %v3202_v26 = vpack.c.bf16 %v78_v24, %v76_v23  ;;  %v75_v27 = vld [vmem:[%s6008_s1 + $0x80] sm:$0xff]  ;;  %v77_v28 = vld [vmem:[%s6008_s1 + $0x90] sm:$0xff]  ;;  %v46_v29 = vld [vmem:[%s6007_s0 + $0x8] sm:$0xff] }
   0x8   :  { %v80_v30 = vld [vmem:[%s6008_s1 + $0xa8] sm:$0xff]  ;;  %v82_v31 = vld [vmem:[%s6008_s1 + $0xb8] sm:$0xff]  ;;  %2811 = vmatprep.mubr.msk.f32.mxu0 %vm111_vm0, %v46_v29  ;;  %v3204_v32 = vpack.c.bf16 %v77_v28, %v75_v27  ;;  %v79_v34 = vld [vmem:[%s6008_s1 + $0xa0] sm:$0xff] }
   0x9   :  { %3193 = vmatpush1.bf16.msra.mxu0 %v3192_v13  ;;  %v3206_v33 = vpack.c.bf16 %v82_v31, %v80_v30  ;;  %v81_v35 = vld [vmem:[%s6008_s1 + $0xb0] sm:$0xff]  ;;  %v84_v36 = vld [vmem:[%s6008_s1 + $0xc8] sm:$0xff]  ;;  %v86_v37 = vld [vmem:[%s6008_s1 + $0xd8] sm:$0xff] }
   0xa   :  { %3195 = vmatprep.subr.bf16.mxu0 %v3194_v14 }
   0xd   :  { %3197 = vmatpush1.bf16.msra.mxu0 %v3196_v19 }
   0xe   :  { %3199 = vmatprep.subr.bf16.mxu0 %v3198_v20 }
  0x11   :  { %3201 = vmatpush1.bf16.msra.mxu0 %v3200_v25 }
  0x12   :  { %3203 = vmatprep.subr.bf16.mxu0 %v3202_v26 }
  0x13   :  { %18 = vsyncpa [#allocation3], 0  ;;  %v3208_v38 = vpack.c.bf16 %v81_v35, %v79_v34  ;;  %v3210_v39 = vpack.c.bf16 %v86_v37, %v84_v36  ;;  %v83_v40 = vld [vmem:[%s6008_s1 + $0xc0] sm:$0xff]  ;;  %v85_v41 = vld [vmem:[%s6008_s1 + $0xd0] sm:$0xff]  ;;  %v3959_v10 = vmov 0.0   ;;  %v101_v11 = vlaneseq  ;;  %s3960_s26 = smov 40  }
  0x14   :  { %v88_v42 = vld [vmem:[%s6008_s1 + $0xe8] sm:$0xff]  ;;  %v90_v43 = vld [vmem:[%s6008_s1 + $0xf8] sm:$0xff]  ;;  %v3212_v44 = vpack.c.bf16 %v85_v41, %v83_v40  ;;  %v87_v46 = vld [vmem:[%s6008_s1 + $0xe0] sm:$0xff]  ;;  %391 = vmatprep.mubr.f32.mxu1 %v3959_v10  ;;  %vm314_vm1 = vcmask 457728   ;;  %vm424_vm2 = vcmask 1046528   ;;  %vm461_vm3 = vcmask 1045504  }
  0x15   :  { %3205 = vmatpush1.bf16.msra.mxu0 %v3204_v32  ;;  %v3214_v45 = vpack.c.bf16 %v90_v43, %v88_v42  ;;  %v89_v47 = vld [vmem:[%s6008_s1 + $0xf0] sm:$0xff]  ;;  %v92_v48 = vld [vmem:[%s6008_s1 + $0x108] sm:$0xff]  ;;  %v94_v49 = vld [vmem:[%s6008_s1 + $0x118] sm:$0xff]  ;;  %v4211_v12 = vshrl.u32 %v101_v11, 7  ;;  %vm498_vm4 = vcmask 1044480   ;;  %vm538_vm5 = vcmask 1043456  }
  0x16   :  { %3207 = vmatprep.subr.bf16.mxu0 %v3206_v33  ;;  %v3216_v50 = vpack.c.bf16 %v89_v47, %v87_v46  ;;  %v3218_v51 = vpack.c.bf16 %v94_v49, %v92_v48  ;;  %v91_v52 = vld [vmem:[%s6008_s1 + $0x100] sm:$0xff]  ;;  %v93_v53 = vld [vmem:[%s6008_s1 + $0x110] sm:$0xff]  ;;  %v96_v54 = vld [vmem:[%s6008_s1 + $0x128] sm:$0xff]  ;;  %s3961_s27 = smov 80   ;;  %vm451_vm6 = vcmask 326656   ;;  %vm488_vm7 = vcmask 654336  }
  0x17   :  { %v98_v55 = vld [vmem:[%s6008_s1 + $0x138] sm:$0xff]  ;;  %v3220_v56 = vpack.c.bf16 %v93_v53, %v91_v52  ;;  %v95_v58 = vld [vmem:[%s6008_s1 + $0x120] sm:$0xff]  ;;  %v97_v59 = vld [vmem:[%s6008_s1 + $0x130] sm:$0xff]  ;;  %v103_v13 = vsub.s32 0, %v4211_v12  ;;  %v107_v15 = vsub.s32 1, %v4211_v12  ;;  %s3962_s1 = smov 120  }
  0x18   :  { %v3222_v57 = vpack.c.bf16 %v98_v55, %v96_v54  ;;  %v3224_v60 = vpack.c.bf16 %v97_v59, %v95_v58  ;;  %v45_v61 = vld [vmem:[%s6007_s0] sm:$0xff]  ;;  %v48_v62 = vld [vmem:[%s6007_s0 + $0x18] sm:$0xff]  ;;  %v47_v63 = vld [vmem:[%s6007_s0 + $0x10] sm:$0xff]  ;;  %vm525_vm8 = vcmask 982016   ;;  %vm805_vm9 = vcmask 588800   ;;  %s3965_s18 = smov 96  }
  0x19   :  { %3209 = vmatpush1.bf16.msra.mxu0 %v3208_v38  ;;  %v50_v0 = vld [vmem:[%s6007_s0 + $0x28] sm:$0xff]  ;;  %v49_v1 = vld [vmem:[%s6007_s0 + $0x20] sm:$0xff]  ;;  %v52_v2 = vld [vmem:[%s6007_s0 + $0x38] sm:$0xff]  ;;  %vm1262_vm10 = vcmask 1042432   ;;  %vm1287_vm11 = vcmask 1041408   ;;  %vm1312_vm12 = vcmask 1040384  }
  0x1a   :  { %3211 = vmatprep.subr.bf16.mxu0 %v3210_v39  ;;  %v51_v3 = vld [vmem:[%s6007_s0 + $0x30] sm:$0xff]  ;;  %v54_v4 = vld [vmem:[%s6007_s0 + $0x48] sm:$0xff]  ;;  %v53_v5 = vld [vmem:[%s6007_s0 + $0x40] sm:$0xff]  ;;  %vm3966_vm13 = vmmov 1   ;;  %vm1218_vm15 = vcmask 523264  }
  0x1b   :  { %v56_v6 = vld [vmem:[%s6007_s0 + $0x58] sm:$0xff]  ;;  %v55_v7 = vld [vmem:[%s6007_s0 + $0x50] sm:$0xff]  ;;  %v58_v8 = vld [vmem:[%s6007_s0 + $0x68] sm:$0xff] }
  0x1c   :  { %v57_v9 = vld [vmem:[%s6007_s0 + $0x60] sm:$0xff]  ;;  %vm5161_vm14 = vmpackc.low %vm424_vm2, %vm3966_vm13 }
  0x1d   :  { %3213 = vmatpush1.bf16.msra.mxu0 %v3212_v44  ;;  %v99_v14 = vld [vmem:[%s6009_s2] sm:$0x3] }
  0x1e   :  { %3215 = vmatprep.subr.bf16.mxu0 %v3214_v45  ;;  %v4220_v16 = vrot.slane %v99_v14, %v103_v13  ;;  %v4224_v17 = vrot.slane %v99_v14, %v107_v15 }
  0x21   :  { %3217 = vmatpush1.bf16.msra.mxu0 %v3216_v50 }
  0x22   :  { %3219 = vmatprep.subr.bf16.mxu0 %v3218_v51 }
  0x25   :  { %3221 = vmatpush1.bf16.msra.mxu0 %v3220_v56 }
  0x26   :  { %3223 = vmatprep.subr.bf16.mxu0 %v3222_v57 }
  0x29   :  { %3225 = vmatpush1.bf16.msra.mxu0 %v3224_v60 }
  0x2c   :  { %198 = vmatmul.mubr.f32.vlgmr.msra.gmra.mrb[0].mxu0 %v45_v61 }
  0x2d   :  { %2812 = vmatprep.mubr.msk.f32.mxu0 %vm111_vm0, %v48_v62 }
  0x30   :  { %204 = vmatmul.mubr.f32.gmra.mrb[2].mxu0 %v47_v63 }
  0x31   :  { %2813 = vmatprep.mubr.msk.f32.mxu0 %vm111_vm0, %v50_v0 }
  0x34   :  { %210 = vmatmul.mubr.f32.gmra.mrb[4].mxu0 %v49_v1 }
  0x35   :  { %2814 = vmatprep.mubr.msk.f32.mxu0 %vm111_vm0, %v52_v2 }
  0x38   :  { %216 = vmatmul.mubr.f32.gmra.mrb[6].mxu0 %v51_v3 }
  0x39   :  { %2815 = vmatprep.mubr.msk.f32.mxu0 %vm111_vm0, %v54_v4 }
  0x3c   :  { %222 = vmatmul.mubr.f32.gmra.mrb[8].mxu0 %v53_v5 }
  0x3d   :  { %2816 = vmatprep.mubr.msk.f32.mxu0 %vm111_vm0, %v56_v6 }
  0x40   :  { %228 = vmatmul.mubr.f32.gmra.mrb[10].mxu0 %v55_v7 }
  0x41   :  { %2817 = vmatprep.mubr.msk.f32.mxu0 %vm111_vm0, %v58_v8 }
  0x44   :  { %234 = vmatmul.mubr.f32.gmra.mrb[12].mxu0 %v57_v9 }
  0x45   :  { %1469 = vmatprep.mubr.f32.mxu0 %v3959_v10 }
  0xff   :  { %v199_v18 = vpop.f32.mrb[0].mxu0 }
 0x100   :  { %v200_v19 = vadd.f32 %v199_v18, %v4220_v16  ;;  %v201_v20 = vpop.f32.mrb[1].mxu0 }
 0x101   :  { %v202_v21 = vadd.f32 %v201_v20, %v4224_v17 }
 0x102   :  { %v240_v22 = vsub.f32 0.0, %v200_v19 }
 0x103   :  { %v241_v23 = vsub.f32 0.0, %v202_v21  ;;  %v205_v24 = vpop.f32.mrb[2].mxu0 }
 0x104   :  { %v254_v25 = vmul.f32 1.442695, %v240_v22  ;;  %v206_v26 = vadd.f32 %v205_v24, %v4220_v16  ;;  %v207_v27 = vpop.f32.mrb[3].mxu0 }
 0x105   :  { %v256_v28 = vmul.f32 1.442695, %v241_v23  ;;  %v208_v29 = vadd.f32 %v207_v27, %v4224_v17 }
 0x106   :  { %3851 = vpow2.f32 %v254_v25  ;;  %v242_v30 = vsub.f32 0.0, %v206_v26 }
 0x107   :  { %3853 = vpow2.f32 %v256_v28  ;;  %v243_v31 = vsub.f32 0.0, %v208_v29  ;;  %v211_v32 = vpop.f32.mrb[4].mxu0 }
 0x108   :  { %v258_v33 = vmul.f32 1.442695, %v242_v30  ;;  %v212_v34 = vadd.f32 %v211_v32, %v4220_v16  ;;  %v213_v35 = vpop.f32.mrb[5].mxu0 }
 0x109   :  { %v260_v36 = vmul.f32 1.442695, %v243_v31  ;;  %v214_v37 = vadd.f32 %v213_v35, %v4224_v17 }
 0x10a   :  { %3855 = vpow2.f32 %v258_v33  ;;  %v244_v38 = vsub.f32 0.0, %v212_v34 }
 0x10b   :  { %3857 = vpow2.f32 %v260_v36  ;;  %v245_v39 = vsub.f32 0.0, %v214_v37  ;;  %v217_v40 = vpop.f32.mrb[6].mxu0 }
 0x10c   :  { %v262_v41 = vmul.f32 1.442695, %v244_v38  ;;  %v218_v42 = vadd.f32 %v217_v40, %v4220_v16  ;;  %v219_v43 = vpop.f32.mrb[7].mxu0 }
 0x10d   :  { %v264_v44 = vmul.f32 1.442695, %v245_v39  ;;  %v220_v45 = vadd.f32 %v219_v43, %v4224_v17 }
 0x10e   :  { %3859 = vpow2.f32 %v262_v41  ;;  %v246_v46 = vsub.f32 0.0, %v218_v42 }
 0x10f   :  { %v247_v47 = vsub.f32 0.0, %v220_v45  ;;  %v223_v48 = vpop.f32.mrb[8].mxu0  ;;  %3861 = vpow2.f32 %v264_v44 }
 0x110   :  { %v3852_v49 = vpop.eup %3851  ;;  %v266_v50 = vmul.f32 1.442695, %v246_v46  ;;  %v224_v51 = vadd.f32 %v223_v48, %v4220_v16  ;;  %v225_v52 = vpop.f32.mrb[9].mxu0 }
 0x111   :  { %v3854_v53 = vpop.eup %3853  ;;  %v282_v54 = vadd.f32 1.0, %v3852_v49  ;;  %v268_v55 = vmul.f32 1.442695, %v247_v47  ;;  %v226_v56 = vadd.f32 %v225_v52, %v4224_v17 }
 0x112   :  { %v283_v57 = vadd.f32 1.0, %v3854_v53  ;;  %3863 = vpow2.f32 %v266_v50  ;;  %v248_v58 = vsub.f32 0.0, %v224_v51 }
 0x113   :  { %3865 = vrcp.f32 %v282_v54  ;;  %v249_v59 = vsub.f32 0.0, %v226_v56  ;;  %v229_v60 = vpop.f32.mrb[10].mxu0 }
 0x114   :  { %v3856_v61 = vpop.eup %3855  ;;  %3867 = vrcp.f32 %v283_v57  ;;  %v270_v62 = vmul.f32 1.442695, %v248_v58  ;;  %v230_v63 = vadd.f32 %v229_v60, %v4220_v16  ;;  %v231_v0 = vpop.f32.mrb[11].mxu0 }
 0x115   :  { %v3858_v1 = vpop.eup %3857  ;;  %v284_v2 = vadd.f32 1.0, %v3856_v61  ;;  %3869 = vpow2.f32 %v268_v55  ;;  %v272_v3 = vmul.f32 1.442695, %v249_v59  ;;  %v232_v4 = vadd.f32 %v231_v0, %v4224_v17  ;;  %v310_v61 = vld [vmem:[%s6010_s3] sm:$0xff]  ;;  %v312_v0 = vld [vmem:[%s6010_s3 + $0x10] sm:$0xff] }
 0x116   :  { %v285_v5 = vadd.f32 1.0, %v3858_v1  ;;  %3871 = vpow2.f32 %v270_v62  ;;  %v250_v6 = vsub.f32 0.0, %v230_v63  ;;  %v311_v63 = vld [vmem:[%s6010_s3 + $0x8] sm:$0xff]  ;;  %v313_v1 = vld [vmem:[%s6010_s3 + $0x18] sm:$0xf]  ;;  %s3963_s3 = smov 32  }
 0x117   :  { %3873 = vrcp.f32 %v284_v2  ;;  %v251_v7 = vsub.f32 0.0, %v232_v4  ;;  %v235_v8 = vpop.f32.mrb[12].mxu0  ;;  %v584_v2 = vld [vmem:[%s6011_s4 + $0x8] sm:$0xff]  ;;  %v583_v4 = vld [vmem:[%s6011_s4] sm:$0xff] }
 0x118   :  { %v3860_v9 = vpop.eup %3859  ;;  %3875 = vrcp.f32 %v285_v5  ;;  %v274_v11 = vmul.f32 1.442695, %v250_v6  ;;  %v236_v14 = vadd.f32 %v235_v8, %v4220_v16  ;;  %v237_v18 = vpop.f32.mrb[13].mxu0  ;;  %v585_v6 = vld [vmem:[%s6011_s4 + $0x10] sm:$0xff]  ;;  %v590_v8 = vld [vmem:[%s6011_s4 + $0x38] sm:$0xff] }
 0x119   :  { %v286_v19 = vadd.f32 1.0, %v3860_v9  ;;  %3877 = vpow2.f32 %v272_v3  ;;  %v276_v20 = vmul.f32 1.442695, %v251_v7  ;;  %v238_v21 = vadd.f32 %v237_v18, %v4224_v17  ;;  %v3862_v22 = vpop.eup %3861  ;;  %v586_v3 = vld [vmem:[%s6011_s4 + $0x18] sm:$0xff]  ;;  %v588_v7 = vld [vmem:[%s6011_s4 + $0x28] sm:$0xff]  ;;  %v589_v18 = vld [vmem:[%s6011_s4 + $0x30] sm:$0xff] }
 0x11a   :  { %3879 = vpow2.f32 %v274_v11  ;;  %v252_v23 = vsub.f32 0.0, %v236_v14  ;;  %v287_v28 = vadd.f32 1.0, %v3862_v22  ;;  %v3238_v5 = vpack.c.bf16 %v586_v3, %v584_v2  ;;  %v587_v14 = vld [vmem:[%s6011_s4 + $0x20] sm:$0xff]  ;;  %v626_v2 = vld [vmem:[%s6011_s4 + $0x158] sm:$0xff] }
 0x11b   :  { %v253_v24 = vsub.f32 0.0, %v238_v21  ;;  %3881 = vrcp.f32 %v286_v19  ;;  %v3240_v9 = vpack.c.bf16 %v585_v6, %v583_v4  ;;  %v3242_v11 = vpack.c.bf16 %v590_v8, %v588_v7  ;;  %v592_v19 = vld [vmem:[%s6011_s4 + $0x48] sm:$0xff]  ;;  %v625_v6 = vld [vmem:[%s6011_s4 + $0x150] sm:$0xff]  ;;  %v630_v8 = vld [vmem:[%s6011_s4 + $0x178] sm:$0xff] }
 0x11c   :  { %v3864_v25 = vpop.eup %3863  ;;  %v278_v26 = vmul.f32 1.442695, %v252_v23  ;;  %3883 = vpow2.f32 %v276_v20  ;;  %v594_v20 = vld [vmem:[%s6011_s4 + $0x58] sm:$0xff]  ;;  %v3244_v21 = vpack.c.bf16 %v589_v18, %v587_v14  ;;  %v591_v23 = vld [vmem:[%s6011_s4 + $0x40] sm:$0xff]  ;;  %v628_v7 = vld [vmem:[%s6011_s4 + $0x168] sm:$0xff] }
 0x11d   :  { %v3866_v27 = vpop.eup %3865  ;;  %v288_v29 = vadd.f32 1.0, %v3864_v25  ;;  %v280_v30 = vmul.f32 1.442695, %v253_v24  ;;  %v3246_v22 = vpack.c.bf16 %v594_v20, %v592_v19  ;;  %v593_v24 = vld [vmem:[%s6011_s4 + $0x50] sm:$0xff]  ;;  %v596_v25 = vld [vmem:[%s6011_s4 + $0x68] sm:$0xff]  ;;  %v627_v14 = vld [vmem:[%s6011_s4 + $0x160] sm:$0xff] }
 0x11e   :  { %v3868_v31 = vpop.eup %3867  ;;  %3885 = vpow2.f32 %v278_v26  ;;  %v598_v26 = vld [vmem:[%s6011_s4 + $0x78] sm:$0xff]  ;;  %v629_v18 = vld [vmem:[%s6011_s4 + $0x170] sm:$0xff]  ;;  %v632_v19 = vld [vmem:[%s6011_s4 + $0x188] sm:$0xff] }
 0x11f   :  { %v3870_v16 = vpop.eup %3869  ;;  %3887 = vrcp.f32 %v288_v29  ;;  %v595_v29 = vld [vmem:[%s6011_s4 + $0x60] sm:$0xff]  ;;  %v634_v20 = vld [vmem:[%s6011_s4 + $0x198] sm:$0xff] }
 0x120   :  { %v3872_v32 = vpop.eup %3871  ;;  %v289_v33 = vadd.f32 1.0, %v3870_v16  ;;  %3889 = vpow2.f32 %v280_v30  ;;  %v597_v30 = vld [vmem:[%s6011_s4 + $0x70] sm:$0xff]  ;;  %v602_v16 = vld [vmem:[%s6011_s4 + $0x98] sm:$0xff] }
 0x121   :  { %v3874_v17 = vpop.eup %3873  ;;  %3891 = vrcp.f32 %v287_v28  ;;  %v290_v35 = vadd.f32 1.0, %v3872_v32  ;;  %v3250_v28 = vpack.c.bf16 %v598_v26, %v596_v25  ;;  %v3252_v32 = vpack.c.bf16 %v597_v30, %v595_v29  ;;  %v636_v25 = vld [vmem:[%s6011_s4 + $0x1a8] sm:$0xff]  ;;  %v638_v26 = vld [vmem:[%s6011_s4 + $0x1b8] sm:$0xff]  ;;  %v635_v29 = vld [vmem:[%s6011_s4 + $0x1a0] sm:$0xff] }
 0x122   :  { %v3876_v34 = vpop.eup %3875  ;;  %3893 = vrcp.f32 %v289_v33  ;;  %v3228_v36 = vpack.c.bf16 %v3874_v17, %v3866_v27  ;;  %v3248_v27 = vpack.c.bf16 %v593_v24, %v591_v23  ;;  %v599_v17 = vld [vmem:[%s6011_s4 + $0x80] sm:$0xff]  ;;  %v633_v24 = vld [vmem:[%s6011_s4 + $0x190] sm:$0xff] }
 0x123   :  { %v3878_v37 = vpop.eup %3877  ;;  %v3226_v38 = vpack.c.bf16 %v3876_v34, %v3868_v31  ;;  %3895 = vrcp.f32 %v290_v35  ;;  %v600_v31 = vld [vmem:[%s6011_s4 + $0x88] sm:$0xff]  ;;  %v601_v34 = vld [vmem:[%s6011_s4 + $0x90] sm:$0xff]  ;;  %v631_v23 = vld [vmem:[%s6011_s4 + $0x180] sm:$0xff] }
 0x124   :  { %v3880_v39 = vpop.eup %3879  ;;  %v291_v40 = vadd.f32 1.0, %v3878_v37  ;;  %v3254_v33 = vpack.c.bf16 %v602_v16, %v600_v31  ;;  %v604_v35 = vld [vmem:[%s6011_s4 + $0xa8] sm:$0xff]  ;;  %v3256_v37 = vpack.c.bf16 %v601_v34, %v599_v17  ;;  %v637_v30 = vld [vmem:[%s6011_s4 + $0x1b0] sm:$0xff]  ;;  %v642_v16 = vld [vmem:[%s6011_s4 + $0x1d8] sm:$0xff] }
 0x125   :  { %v292_v41 = vadd.f32 1.0, %v3880_v39  ;;  %3227 = vmatprep.subr.bf16.mxu1 %v3226_v38  ;;  %v3882_v42 = vpop.eup %3881  ;;  %v603_v39 = vld [vmem:[%s6011_s4 + $0xa0] sm:$0xff]  ;;  %v640_v31 = vld [vmem:[%s6011_s4 + $0x1c8] sm:$0xff]  ;;  %v641_v34 = vld [vmem:[%s6011_s4 + $0x1d0] sm:$0xff] }
 0x126   :  { %3229 = vmatpush1.bf16.msra.mxu1 %v3228_v36  ;;  %v3884_v43 = vpop.eup %3883  ;;  %v606_v36 = vld [vmem:[%s6011_s4 + $0xb8] sm:$0xff]  ;;  %v639_v17 = vld [vmem:[%s6011_s4 + $0x1c0] sm:$0xff] }
 0x127   :  { %3897 = vrcp.f32 %v292_v41  ;;  %v293_v45 = vadd.f32 1.0, %v3884_v43  ;;  %v3258_v38 = vpack.c.bf16 %v606_v36, %v604_v35  ;;  %v608_v41 = vld [vmem:[%s6011_s4 + $0xc8] sm:$0xff]  ;;  %v646_v36 = vld [vmem:[%s6011_s4 + $0x1f8] sm:$0xff] }
 0x128   :  { %v3886_v44 = vpop.eup %3885  ;;  %3899 = vrcp.f32 %v291_v40  ;;  %v605_v40 = vld [vmem:[%s6011_s4 + $0xb0] sm:$0xff]  ;;  %v644_v35 = vld [vmem:[%s6011_s4 + $0x1e8] sm:$0xff] }
 0x129   :  { %v3888_v46 = vpop.eup %3887  ;;  %3901 = vrcp.f32 %v293_v45  ;;  %v294_v52 = vadd.f32 1.0, %v3886_v44  ;;  %v3260_v43 = vpack.c.bf16 %v605_v40, %v603_v39  ;;  %v607_v45 = vld [vmem:[%s6011_s4 + $0xc0] sm:$0xff]  ;;  %v645_v40 = vld [vmem:[%s6011_s4 + $0x1f0] sm:$0xff] }
 0x12a   :  { %v3890_v47 = vpop.eup %3889  ;;  %v3232_v48 = vpack.c.bf16 %v3888_v46, %v3882_v42  ;;  %v610_v42 = vld [vmem:[%s6011_s4 + $0xd8] sm:$0xff]  ;;  %v609_v46 = vld [vmem:[%s6011_s4 + $0xd0] sm:$0xff]  ;;  %v643_v39 = vld [vmem:[%s6011_s4 + $0x1e0] sm:$0xff] }
 0x12b   :  { %v3892_v49 = vpop.eup %3891  ;;  %v295_v50 = vadd.f32 1.0, %v3890_v47  ;;  %v3262_v44 = vpack.c.bf16 %v610_v42, %v608_v41  ;;  %v612_v47 = vld [vmem:[%s6011_s4 + $0xe8] sm:$0xff]  ;;  %v3300_v41 = vpack.c.bf16 %v645_v40, %v643_v39 }
 0x12c   :  { %v3894_v51 = vpop.eup %3893  ;;  %v648_v42 = vld [vmem:[%s6011_s4 + $0x208] sm:$0xff] }
 0x12d   :  { %3903 = vrcp.f32 %v295_v50  ;;  %v3230_v53 = vpack.c.bf16 %v3894_v51, %v3892_v49  ;;  %v3896_v54 = vpop.eup %3895  ;;  %v3264_v49 = vpack.c.bf16 %v609_v46, %v607_v45  ;;  %v611_v51 = vld [vmem:[%s6011_s4 + $0xe0] sm:$0xff] }
 0x12e   :  { %3905 = vrcp.f32 %v294_v52  ;;  %v613_v52 = vld [vmem:[%s6011_s4 + $0xf0] sm:$0xff] }
 0x12f   :  { %3231 = vmatprep.subr.bf16.mxu1 %v3230_v53  ;;  %v616_v53 = vld [vmem:[%s6011_s4 + $0x108] sm:$0xff] }
 0x130   :  { %3233 = vmatpush1.bf16.msra.mxu1 %v3232_v48  ;;  %v614_v48 = vld [vmem:[%s6011_s4 + $0xf8] sm:$0xff] }
 0x131   :  { %v3898_v55 = vpop.eup %3897  ;;  %v3266_v50 = vpack.c.bf16 %v614_v48, %v612_v47 }
 0x132   :  { %v3236_v56 = vpack.c.bf16 %v3898_v55, %v3896_v54  ;;  %v3900_v57 = vpop.eup %3899  ;;  %v618_v54 = vld [vmem:[%s6011_s4 + $0x118] sm:$0xff]  ;;  %v3268_v55 = vpack.c.bf16 %v613_v52, %v611_v51 }
 0x133   :  { %v3902_v58 = vpop.eup %3901 }
 0x134   :  { %v3234_v59 = vpack.c.bf16 %v3902_v58, %v3900_v57  ;;  %v615_v57 = vld [vmem:[%s6011_s4 + $0x100] sm:$0xff]  ;;  %v617_v58 = vld [vmem:[%s6011_s4 + $0x110] sm:$0xff] }
 0x136   :  { %3235 = vmatprep.subr.bf16.mxu1 %v3234_v59  ;;  %v620_v59 = vld [vmem:[%s6011_s4 + $0x128] sm:$0xff] }
 0x137   :  { %v3904_v60 = vpop.eup %3903  ;;  %3237 = vmatpush1.bf16.msra.mxu1 %v3236_v56  ;;  %v3270_v56 = vpack.c.bf16 %v618_v54, %v616_v53 }
 0x138   :  { %339 = vmatprep.subr.mxu1 %v3904_v60  ;;  %v3906_v62 = vpop.eup %3905  ;;  %v622_v60 = vld [vmem:[%s6011_s4 + $0x138] sm:$0xff] }
 0x13b   :  { %340 = vmatpush1.msra.mxu1 %v3906_v62  ;;  %v3274_v62 = vpack.c.bf16 %v622_v60, %v620_v59 }
 0x13c   :  { %2818 = vmatmul.mubr.msk.f32.vlgmr.msra.gmra.mrb[0].mxu1 %vm314_vm1, %v310_v61  ;;  %3239 = vmatprep.subr.bf16.mxu1 %v3238_v5  ;;  %v3272_v61 = vpack.c.bf16 %v617_v58, %v615_v57  ;;  %v623_v5 = vld [vmem:[%s6011_s4 + $0x140] sm:$0xff] }
 0x13d   :  { %397 = vmatprep.mubr.f32.mxu1 %v3959_v10  ;;  %3241 = vmatpush1.bf16.msra.mxu1 %v3240_v9  ;;  %v3280_v9 = vpack.c.bf16 %v625_v6, %v623_v5 }
 0x13e   :  { %3243 = vmatprep.subr.bf16.mxu1 %v3242_v11  ;;  %v3282_v11 = vpack.c.bf16 %v630_v8, %v628_v7 }
 0x140   :  { %2819 = vmatmul.mubr.msk.f32.gmra.mrb[2].mxu1 %vm314_vm1, %v311_v63  ;;  %v619_v63 = vld [vmem:[%s6011_s4 + $0x120] sm:$0xff] }
 0x141   :  { %403 = vmatprep.mubr.f32.mxu1 %v3959_v10  ;;  %3245 = vmatpush1.bf16.msra.mxu1 %v3244_v21  ;;  %v3284_v21 = vpack.c.bf16 %v629_v18, %v627_v14 }
 0x142   :  { %3247 = vmatprep.subr.bf16.mxu1 %v3246_v22  ;;  %v3286_v22 = vpack.c.bf16 %v634_v20, %v632_v19 }
 0x144   :  { %2820 = vmatmul.mubr.msk.f32.gmra.mrb[4].mxu1 %vm314_vm1, %v312_v0  ;;  %v621_v0 = vld [vmem:[%s6011_s4 + $0x130] sm:$0xff] }
 0x145   :  { %409 = vmatprep.mubr.f32.mxu1 %v3959_v10  ;;  %3249 = vmatpush1.bf16.msra.mxu1 %v3248_v27  ;;  %v3276_v3 = vpack.c.bf16 %v621_v0, %v619_v63  ;;  %v3288_v27 = vpack.c.bf16 %v633_v24, %v631_v23 }
 0x146   :  { %3251 = vmatprep.subr.bf16.mxu1 %v3250_v28  ;;  %v3290_v28 = vpack.c.bf16 %v638_v26, %v636_v25 }
 0x148   :  { %2821 = vmatmul.mubr.msk.f32.gmra.mrb[6].mxu1 %vm314_vm1, %v313_v1  ;;  %v624_v1 = vld [vmem:[%s6011_s4 + $0x148] sm:$0xff]  ;;  %vm1368_vm1 = vcmask 121856  }
 0x149   :  { %3253 = vmatpush1.bf16.msra.mxu1 %v3252_v32  ;;  %v3278_v4 = vpack.c.bf16 %v626_v2, %v624_v1  ;;  %v3292_v32 = vpack.c.bf16 %v637_v30, %v635_v29 }
 0x14a   :  { %3255 = vmatprep.subr.bf16.mxu1 %v3254_v33  ;;  %v3294_v33 = vpack.c.bf16 %v642_v16, %v640_v31 }
 0x14d   :  { %3257 = vmatpush1.bf16.msra.mxu1 %v3256_v37  ;;  %v3296_v37 = vpack.c.bf16 %v641_v34, %v639_v17 }
 0x14e   :  { %3259 = vmatprep.subr.bf16.mxu1 %v3258_v38  ;;  %v3298_v38 = vpack.c.bf16 %v646_v36, %v644_v35 }
 0x151   :  { %3261 = vmatpush1.bf16.msra.mxu1 %v3260_v43  ;;  %v650_v43 = vld [vmem:[%s6011_s4 + $0x218] sm:$0xff] }
 0x152   :  { %3263 = vmatprep.subr.bf16.mxu1 %v3262_v44  ;;  %v3302_v44 = vpack.c.bf16 %v650_v43, %v648_v42 }
 0x155   :  { %3265 = vmatpush1.bf16.msra.mxu1 %v3264_v49 }
 0x156   :  { %3267 = vmatprep.subr.bf16.mxu1 %v3266_v50 }
 0x159   :  { %3269 = vmatpush1.bf16.msra.mxu1 %v3268_v55 }
 0x15a   :  { %3271 = vmatprep.subr.bf16.mxu1 %v3270_v56 }
 0x15d   :  { %3273 = vmatpush1.bf16.msra.mxu1 %v3272_v61 }
 0x15e   :  { %3275 = vmatprep.subr.bf16.mxu1 %v3274_v62 }
 0x161   :  { %3277 = vmatpush1.bf16.msra.mxu1 %v3276_v3 }
 0x162   :  { %3279 = vmatprep.subr.bf16.mxu1 %v3278_v4 }
 0x165   :  { %3281 = vmatpush1.bf16.msra.mxu1 %v3280_v9 }
 0x166   :  { %3283 = vmatprep.subr.bf16.mxu1 %v3282_v11 }
 0x169   :  { %3285 = vmatpush1.bf16.msra.mxu1 %v3284_v21 }
 0x16a   :  { %3287 = vmatprep.subr.bf16.mxu1 %v3286_v22 }
 0x16d   :  { %3289 = vmatpush1.bf16.msra.mxu1 %v3288_v27 }
 0x16e   :  { %3291 = vmatprep.subr.bf16.mxu1 %v3290_v28 }
 0x171   :  { %3293 = vmatpush1.bf16.msra.mxu1 %v3292_v32 }
 0x172   :  { %3295 = vmatprep.subr.bf16.mxu1 %v3294_v33 }
 0x175   :  { %3297 = vmatpush1.bf16.msra.mxu1 %v3296_v37 }
 0x176   :  { %3299 = vmatprep.subr.bf16.mxu1 %v3298_v38 }
 0x179   :  { %3301 = vmatpush1.bf16.msra.mxu1 %v3300_v41 }
 0x17a   :  { %3303 = vmatprep.subr.bf16.mxu1 %v3302_v44 }
 0x20f   :  { %v4453_v45 = vpop.f32.mrb[0].mxu1 }
 0x210   :  { %v4455_v46 = vpop.f32.mrb[1].mxu1  ;;  %v425_v47 = vrot.slane %v4453_v45, 1  ;;  %v462_v48 = vrot.slane %v4453_v45, 2  ;;  %v499_v49 = vrot.slane %v4453_v45, 3  ;;  %v539_v50 = vrot.slane %v4453_v45, 4 }
 0x211   :  { %v465_v52 = vrot.slane %v4455_v46, 2  ;;  %v428_v53 = vrot.slane %v4455_v46, 1  ;;  %v502_v54 = vrot.slane %v4455_v46, 3  ;;  %v542_v55 = vrot.slane %v4455_v46, 4 }
 0x213   :  { %v4461_v51 = vpop.f32.mrb[2].mxu1 }
 0x214   :  { %v4467_v56 = vpop.f32.mrb[3].mxu1  ;;  %v426_v57 = vrot.slane %v4461_v51, 1  ;;  %v463_v58 = vrot.slane %v4461_v51, 2  ;;  %v500_v59 = vrot.slane %v4461_v51, 3  ;;  %v540_v60 = vrot.slane %v4461_v51, 4 }
 0x215   :  { %v466_v61 = vrot.slane %v4467_v56, 2  ;;  %v429_v62 = vrot.slane %v4467_v56, 1  ;;  %v503_v63 = vrot.slane %v4467_v56, 3  ;;  %v543_v0 = vrot.slane %v4467_v56, 4 }
 0x216   :  { %v427_v1 = vsel %vm424_vm2, %v425_v47, %v426_v57  ;;  %v464_v2 = vsel %vm461_vm3, %v462_v48, %v463_v58  ;;  %v501_v3 = vsel %vm498_vm4, %v499_v49, %v500_v59  ;;  %v541_v4 = vsel %vm538_vm5, %v539_v50, %v540_v60 }
 0x217   :  { %439 = vrot.lane.b32.xlu0 %v427_v1, %s3960_s26  ;;  %v4482_v5 = vpop.f32.mrb[4].mxu1  ;;  %v467_v6 = vsel %vm461_vm3, %v465_v52, %v466_v61  ;;  %v430_v7 = vsel %vm424_vm2, %v428_v53, %v429_v62  ;;  %v504_v8 = vsel %vm498_vm4, %v502_v54, %v503_v63  ;;  %v544_v9 = vsel %vm538_vm5, %v542_v55, %v543_v0  ;;  %v651_v1 = vld [vmem:[%s6011_s4 + $0x220] sm:$0xff] }
 0x218   :  { %v431_v11 = vrot.slane %v4482_v5, 1  ;;  %v468_v14 = vrot.slane %v4482_v5, 2  ;;  %v4490_v18 = vpop.f32.mrb[5].mxu1  ;;  %v3766_v19 = vpack.i.bf16 %v467_v6, %v464_v2  ;;  %v505_v20 = vrot.slane %v4482_v5, 3  ;;  %v653_v2 = vld [vmem:[%s6011_s4 + $0x230] sm:$0xff] }
 0x219   :  { %v470_v21 = vrot.slane %v4490_v18, 2  ;;  %v433_v22 = vrot.slane %v4490_v18, 1  ;;  %v507_v23 = vrot.slane %v4490_v18, 3  ;;  %v545_v24 = vrot.slane %v4482_v5, 4 }
 0x21a   :  { %3767 = vrot.lane.b32.xlu1 %v3766_v19, %s3961_s27  ;;  %v432_v25 = vsel %vm424_vm2, %v426_v57, %v431_v11  ;;  %v469_v26 = vsel %vm461_vm3, %v463_v58, %v468_v14  ;;  %v506_v27 = vsel %vm498_vm4, %v500_v59, %v505_v20  ;;  %v547_v28 = vrot.slane %v4490_v18, 4  ;;  %v647_v57 = vld [vmem:[%s6011_s4 + $0x200] sm:$0xff]  ;;  %v649_v58 = vld [vmem:[%s6011_s4 + $0x210] sm:$0xff]  ;;  %v652_v59 = vld [vmem:[%s6011_s4 + $0x228] sm:$0xff] }
 0x21b   :  { %v411_v29 = vpop.f32.mrb[6].mxu1  ;;  %v471_v30 = vsel %vm461_vm3, %v466_v61, %v470_v21  ;;  %v434_v31 = vsel %vm424_vm2, %v429_v62, %v433_v22  ;;  %v508_v16 = vsel %vm498_vm4, %v503_v63, %v507_v23  ;;  %v546_v32 = vsel %vm538_vm5, %v540_v60, %v545_v24  ;;  %v654_v60 = vld [vmem:[%s6011_s4 + $0x238] sm:$0xff] }
 0x21c   :  { %v435_v33 = vrot.slane %v411_v29, 1  ;;  %v472_v17 = vrot.slane %v411_v29, 2  ;;  %v509_v34 = vrot.slane %v411_v29, 3  ;;  %v549_v35 = vrot.slane %v411_v29, 4  ;;  %v413_v36 = vpop.f32.mrb[7].mxu1 }
 0x21d   :  { %v3771_v37 = vpack.i.bf16 %v471_v30, %v469_v26  ;;  %v437_v38 = vrot.slane %v413_v36, 1  ;;  %v474_v39 = vrot.slane %v413_v36, 2  ;;  %v511_v40 = vrot.slane %v413_v36, 3  ;;  %v666_v26 = vld [vmem:[%s6011_s4 + $0x298] sm:$0xff] }
 0x21e   :  { %441 = vrot.lane.b32.xlu1 %v430_v7, %s3960_s26  ;;  %v436_v41 = vsel %vm424_vm2, %v431_v11, %v435_v33  ;;  %v551_v42 = vrot.slane %v413_v36, 4  ;;  %v473_v43 = vsel %vm461_vm3, %v468_v14, %v472_v17  ;;  %v510_v44 = vsel %vm498_vm4, %v505_v20, %v509_v34  ;;  %v660_v11 = vld [vmem:[%s6011_s4 + $0x268] sm:$0xff] }
 0x21f   :  { %v3761_v47 = vpack.i.bf16 %v436_v41, %v432_v25  ;;  %v438_v48 = vsel %vm424_vm2, %v433_v22, %v437_v38  ;;  %v475_v49 = vsel %vm461_vm3, %v470_v21, %v474_v39  ;;  %v512_v50 = vsel %vm498_vm4, %v507_v23, %v511_v40  ;;  %v659_v22 = vld [vmem:[%s6011_s4 + $0x260] sm:$0xff]  ;;  %v661_v23 = vld [vmem:[%s6011_s4 + $0x270] sm:$0xff]  ;;  %v664_v25 = vld [vmem:[%s6011_s4 + $0x288] sm:$0xff] }
 0x220   :  { %v3776_v52 = vpack.i.bf16 %v475_v49, %v473_v43  ;;  %v550_v53 = vsel %vm538_vm5, %v545_v24, %v549_v35  ;;  %v548_v54 = vsel %vm538_vm5, %v543_v0, %v547_v28  ;;  %v552_v55 = vsel %vm538_vm5, %v547_v28, %v551_v42  ;;  %v668_v34 = vld [vmem:[%s6011_s4 + $0x2a8] sm:$0xff]  ;;  %v667_v39 = vld [vmem:[%s6011_s4 + $0x2a0] sm:$0xff]  ;;  %v674_v41 = vld [vmem:[%s6011_s4 + $0x2d8] sm:$0xff] }
 0x221   :  { %3762 = vrot.lane.b32.xlu0 %v3761_v47, %s3960_s26  ;;  %v3304_v62 = vpack.c.bf16 %v649_v58, %v647_v57  ;;  %v3306_v0 = vpack.c.bf16 %v654_v60, %v652_v59  ;;  %v3308_v6 = vpack.c.bf16 %v653_v2, %v651_v1  ;;  %v3316_v29 = vpack.c.bf16 %v661_v23, %v659_v22  ;;  %v672_v40 = vld [vmem:[%s6011_s4 + $0x2c8] sm:$0xff]  ;;  %v671_v47 = vld [vmem:[%s6011_s4 + $0x2c0] sm:$0xff]  ;;  %v678_v49 = vld [vmem:[%s6011_s4 + $0x2f8] sm:$0xff] }
 0x222   :  { %3772 = vrot.lane.b32.xlu1 %v3771_v37, %s3961_s27  ;;  %v682_v57 = vld [vmem:[%s6011_s4 + $0x318] sm:$0xff]  ;;  %v679_v60 = vld [vmem:[%s6011_s4 + $0x300] sm:$0xff]  ;;  %v693_v23 = vld [vmem:[%s6011_s4 + $0x370] sm:$0xff] }
 0x223   :  { %v683_v2 = vld [vmem:[%s6011_s4 + $0x320] sm:$0xff] }
 0x224   :  { %v691_v22 = vld [vmem:[%s6011_s4 + $0x360] sm:$0xff] }
 0x225   :  { %513 = vrot.lane.b32.xlu0 %v501_v3, %s3962_s1  ;;  %v656_v3 = vld [vmem:[%s6011_s4 + $0x248] sm:$0xff] }
 0x226   :  { %517 = vrot.lane.b32.xlu1 %v506_v27, %s3962_s1 }
 0x229   :  { %445 = vrot.lane.b32.xlu0 %v434_v31, %s3960_s26  ;;  %v3318_v31 = vpack.c.bf16 %v666_v26, %v664_v25  ;;  %v696_v25 = vld [vmem:[%s6011_s4 + $0x388] sm:$0xff]  ;;  %v698_v26 = vld [vmem:[%s6011_s4 + $0x398] sm:$0xff] }
 0x22a   :  { %449 = vrot.lane.b32.xlu1 %v438_v48, %s3960_s26  ;;  %v673_v48 = vld [vmem:[%s6011_s4 + $0x2d0] sm:$0xff] }
 0x22d   :  { %3777 = vrot.lane.b32.xlu0 %v3776_v52, %s3961_s27 }
 0x22e   :  { %515 = vrot.lane.b32.xlu1 %v504_v8, %s3962_s1  ;;  %v655_v8 = vld [vmem:[%s6011_s4 + $0x240] sm:$0xff] }
 0x231   :  { %521 = vrot.lane.b32.xlu0 %v510_v44, %s3962_s1  ;;  %v3326_v44 = vpack.c.bf16 %v674_v41, %v672_v40  ;;  %v703_v40 = vld [vmem:[%s6011_s4 + $0x3c0] sm:$0xff]  ;;  %v705_v41 = vld [vmem:[%s6011_s4 + $0x3d0] sm:$0xff] }
 0x232   :  { %519 = vrot.lane.b32.xlu1 %v508_v16, %s3962_s1  ;;  %v663_v16 = vld [vmem:[%s6011_s4 + $0x280] sm:$0xff] }
 0x235   :  { %553 = vrot.lane.b32.xlu0 %v541_v4, %s3963_s3  ;;  %v658_v4 = vld [vmem:[%s6011_s4 + $0x258] sm:$0xff] }
 0x236   :  { %523 = vrot.lane.b32.xlu1 %v512_v50, %s3962_s1  ;;  %v3310_v7 = vpack.c.bf16 %v658_v4, %v656_v3  ;;  %v3328_v50 = vpack.c.bf16 %v673_v48, %v671_v47  ;;  %v685_v3 = vld [vmem:[%s6011_s4 + $0x330] sm:$0xff]  ;;  %v688_v4 = vld [vmem:[%s6011_s4 + $0x348] sm:$0xff]  ;;  %v3360_v48 = vpack.c.bf16 %v705_v41, %v703_v40 }
 0x237   :  { %v729_v40 = vld [vmem:[%s6011_s4 + $0x490] sm:$0xff]  ;;  %v732_v41 = vld [vmem:[%s6011_s4 + $0x4a8] sm:$0xff] }
 0x239   :  { %557 = vrot.lane.b32.xlu0 %v546_v32, %s3963_s3  ;;  %v665_v32 = vld [vmem:[%s6011_s4 + $0x290] sm:$0xff] }
 0x23a   :  { %555 = vrot.lane.b32.xlu1 %v544_v9, %s3963_s3  ;;  %v657_v9 = vld [vmem:[%s6011_s4 + $0x250] sm:$0xff]  ;;  %v3320_v37 = vpack.c.bf16 %v665_v32, %v663_v16  ;;  %v700_v32 = vld [vmem:[%s6011_s4 + $0x3a8] sm:$0xff] }
 0x23b   :  { %v3312_v20 = vpack.c.bf16 %v657_v9, %v655_v8  ;;  %v687_v9 = vld [vmem:[%s6011_s4 + $0x340] sm:$0xff]  ;;  %v697_v16 = vld [vmem:[%s6011_s4 + $0x390] sm:$0xff] }
 0x23d   :  { %561 = vrot.lane.b32.xlu0 %v550_v53, %s3963_s3  ;;  %v675_v53 = vld [vmem:[%s6011_s4 + $0x2e0] sm:$0xff] }
 0x23e   :  { %563 = vrot.lane.b32.xlu1 %v552_v55, %s3963_s3  ;;  %v680_v55 = vld [vmem:[%s6011_s4 + $0x308] sm:$0xff] }
 0x23f   :  { %v3334_v59 = vpack.c.bf16 %v682_v57, %v680_v55 }
 0x241   :  { %559 = vrot.lane.b32.xlu0 %v548_v54, %s3963_s3  ;;  %v677_v54 = vld [vmem:[%s6011_s4 + $0x2f0] sm:$0xff] }
 0x242   :  { %v3332_v58 = vpack.c.bf16 %v677_v54, %v675_v53  ;;  %v714_v53 = vld [vmem:[%s6011_s4 + $0x418] sm:$0xff] }
 0x289   :  { %v440_v61 = vpop.permute.xlu0 %439 }
 0x28a   :  { %v571_v63 = vsel %vm451_vm6, %v4455_v46, %v440_v61 }
 0x28b   :  { %876 = vmatprep.mubr.f32.mxu1 %v571_v63  ;;  %v686_v63 = vld [vmem:[%s6011_s4 + $0x338] sm:$0xff] }
 0x28c   :  { %877 = vmatmul.mubr.f32.vlgmr.msra.gmra.mrb[8].mxu1 %v4453_v45  ;;  %v4554_v46 = vpop.permute.xlu1 %3767  ;;  %v662_v45 = vld [vmem:[%s6011_s4 + $0x278] sm:$0xff] }
 0x28d   :  { %3305 = vmatpush1.bf16.msra.mxu1 %v3304_v62  ;;  %v3314_v21 = vpack.c.bf16 %v662_v45, %v660_v11  ;;  %v3770_v33 = vunpack.i.h.bf16 %v4554_v46  ;;  %v3769_v17 = vunpack.i.l.bf16 %v4554_v46  ;;  %v684_v62 = vld [vmem:[%s6011_s4 + $0x328] sm:$0xff]  ;;  %v689_v11 = vld [vmem:[%s6011_s4 + $0x350] sm:$0xff] }
 0x28e   :  { %3307 = vmatprep.subr.bf16.mxu1 %v3306_v0  ;;  %v3338_v1 = vpack.c.bf16 %v686_v63, %v684_v62  ;;  %v692_v45 = vld [vmem:[%s6011_s4 + $0x368] sm:$0xff] }
 0x28f   :  { %v716_v63 = vld [vmem:[%s6011_s4 + $0x428] sm:$0xff] }
 0x290   :  { %v442_v14 = vpop.permute.xlu1 %441 }
 0x291   :  { %3309 = vmatpush1.bf16.msra.mxu1 %v3308_v6  ;;  %v4569_v19 = vsel %vm451_vm6, %v440_v61, %v442_v14  ;;  %v681_v61 = vld [vmem:[%s6011_s4 + $0x310] sm:$0xff]  ;;  %v690_v6 = vld [vmem:[%s6011_s4 + $0x358] sm:$0xff] }
 0x292   :  { %3311 = vmatprep.subr.bf16.mxu1 %v3310_v7  ;;  %v3336_v0 = vpack.c.bf16 %v681_v61, %v679_v60  ;;  %v3340_v7 = vpack.c.bf16 %v685_v3, %v683_v2  ;;  %v3342_v8 = vpack.c.bf16 %v690_v6, %v688_v4  ;;  %v694_v14 = vld [vmem:[%s6011_s4 + $0x378] sm:$0xff]  ;;  %v711_v60 = vld [vmem:[%s6011_s4 + $0x400] sm:$0xff]  ;;  %v713_v61 = vld [vmem:[%s6011_s4 + $0x410] sm:$0xff] }
 0x293   :  { %v4577_v24 = vpop.permute.xlu0 %3762  ;;  %v3368_v3 = vpack.c.bf16 %v713_v61, %v711_v60  ;;  %v715_v6 = vld [vmem:[%s6011_s4 + $0x420] sm:$0xff]  ;;  %v741_v61 = vld [vmem:[%s6011_s4 + $0x4f0] sm:$0xff] }
 0x294   :  { %v3765_v27 = vunpack.i.h.bf16 %v4577_v24  ;;  %v3764_v28 = vunpack.i.l.bf16 %v4577_v24  ;;  %v3773_v47 = vpop.permute.xlu1 %3772  ;;  %v728_v24 = vld [vmem:[%s6011_s4 + $0x488] sm:$0xff]  ;;  %v739_v60 = vld [vmem:[%s6011_s4 + $0x4e0] sm:$0xff] }
 0x295   :  { %3313 = vmatpush1.bf16.msra.mxu1 %v3312_v20  ;;  %v3344_v20 = vpack.c.bf16 %v689_v11, %v687_v9  ;;  %v3775_v54 = vunpack.i.h.bf16 %v3773_v47  ;;  %v3774_v55 = vunpack.i.l.bf16 %v3773_v47  ;;  %v731_v47 = vld [vmem:[%s6011_s4 + $0x4a0] sm:$0xff] }
 0x296   :  { %3315 = vmatprep.subr.bf16.mxu1 %v3314_v21  ;;  %v572_v30 = vsel %vm451_vm6, %v4467_v56, %v3764_v28  ;;  %v670_v56 = vld [vmem:[%s6011_s4 + $0x2b8] sm:$0xff]  ;;  %v573_v35 = vsel %vm451_vm6, %v4490_v18, %v3765_v27  ;;  %v489_v18 = vsel %vm488_vm7, %v3769_v17, %v3770_v33  ;;  %v3346_v21 = vpack.c.bf16 %v694_v14, %v692_v45  ;;  %v720_v45 = vld [vmem:[%s6011_s4 + $0x448] sm:$0xff] }
 0x297   :  { %882 = vmatprep.mubr.f32.mxu1 %v572_v30  ;;  %v4610_v36 = vpop.permute.xlu0 %513  ;;  %v3322_v38 = vpack.c.bf16 %v670_v56, %v668_v34  ;;  %v3350_v30 = vpack.c.bf16 %v698_v26, %v696_v25  ;;  %v702_v33 = vld [vmem:[%s6011_s4 + $0x3b8] sm:$0xff]  ;;  %v490_v2 = vsel %vm488_vm7, %v3774_v55, %v3775_v54  ;;  %v724_v26 = vld [vmem:[%s6011_s4 + $0x468] sm:$0xff]  ;;  %v737_v54 = vld [vmem:[%s6011_s4 + $0x4d0] sm:$0xff] }
 0x298   :  { %883 = vmatmul.mubr.f32.gmra.mrb[10].mxu1 %v4461_v51  ;;  %v669_v51 = vld [vmem:[%s6011_s4 + $0x2b0] sm:$0xff]  ;;  %v577_v42 = vsel %vm525_vm8, %v489_v18, %v4610_v36  ;;  %v3354_v56 = vpack.c.bf16 %v702_v33, %v700_v32  ;;  %v4756_v62 = vpop.permute.xlu1 %517  ;;  %v722_v14 = vld [vmem:[%s6011_s4 + $0x458] sm:$0xff] }
 0x299   :  { %3317 = vmatpush1.bf16.msra.mxu1 %v3316_v29  ;;  %888 = vmatprep.mubr.f32.mxu1 %v573_v35  ;;  %v3324_v43 = vpack.c.bf16 %v669_v51, %v667_v39  ;;  %v3348_v29 = vpack.c.bf16 %v693_v23, %v691_v22  ;;  %v699_v35 = vld [vmem:[%s6011_s4 + $0x3a0] sm:$0xff]  ;;  %v706_v39 = vld [vmem:[%s6011_s4 + $0x3d8] sm:$0xff]  ;;  %v578_v46 = vsel %vm525_vm8, %v490_v2, %v4756_v62 }
 0x29a   :  { %3319 = vmatprep.subr.bf16.mxu1 %v3318_v31  ;;  %v695_v31 = vld [vmem:[%s6011_s4 + $0x380] sm:$0xff]  ;;  %v3374_v22 = vpack.c.bf16 %v722_v14, %v720_v45  ;;  %v749_v14 = vld [vmem:[%s6011_s4 + $0x530] sm:$0xff] }
 0x29b   :  { %v3352_v34 = vpack.c.bf16 %v697_v16, %v695_v31  ;;  %v719_v23 = vld [vmem:[%s6011_s4 + $0x440] sm:$0xff] }
 0x29c   :  { %889 = vmatmul.mubr.f32.gmra.mrb[12].mxu1 %v4482_v5  ;;  %v676_v5 = vld [vmem:[%s6011_s4 + $0x2e8] sm:$0xff]  ;;  %v747_v45 = vld [vmem:[%s6011_s4 + $0x520] sm:$0xff] }
 0x29d   :  { %3321 = vmatpush1.bf16.msra.mxu1 %v3320_v37  ;;  %959 = vmatprep.mubr.f32.mxu1 %v577_v42  ;;  %v3330_v52 = vpack.c.bf16 %v678_v49, %v676_v5  ;;  %v701_v37 = vld [vmem:[%s6011_s4 + $0x3b0] sm:$0xff]  ;;  %v446_v42 = vpop.permute.xlu0 %445  ;;  %v707_v49 = vld [vmem:[%s6011_s4 + $0x3e0] sm:$0xff] }
 0x29e   :  { %3323 = vmatprep.subr.bf16.mxu1 %v3322_v38  ;;  %v704_v38 = vld [vmem:[%s6011_s4 + $0x3c8] sm:$0xff]  ;;  %v3356_v51 = vpack.c.bf16 %v701_v37, %v699_v35 }
 0x29f   :  { %v3358_v18 = vpack.c.bf16 %v706_v39, %v704_v38 }
 0x2a1   :  { %3325 = vmatpush1.bf16.msra.mxu1 %v3324_v43  ;;  %v708_v43 = vld [vmem:[%s6011_s4 + $0x3e8] sm:$0xff]  ;;  %v3778_v57 = vpop.permute.xlu0 %3777 }
 0x2a2   :  { %3327 = vmatprep.subr.bf16.mxu1 %v3326_v44  ;;  %v710_v44 = vld [vmem:[%s6011_s4 + $0x3f8] sm:$0xff]  ;;  %v3779_v9 = vunpack.i.l.bf16 %v3778_v57 }
 0x2a3   :  { %v3362_v5 = vpack.c.bf16 %v710_v44, %v708_v43 }
 0x2a5   :  { %3329 = vmatpush1.bf16.msra.mxu1 %v3328_v50  ;;  %v709_v50 = vld [vmem:[%s6011_s4 + $0x3f0] sm:$0xff]  ;;  %v4775_v11 = vpop.permute.xlu0 %521 }
 0x2a6   :  { %3331 = vmatprep.subr.bf16.mxu1 %v3330_v52  ;;  %v712_v52 = vld [vmem:[%s6011_s4 + $0x408] sm:$0xff] }
 0x2a9   :  { %3333 = vmatpush1.bf16.msra.mxu1 %v3332_v58  ;;  %v3364_v58 = vpack.c.bf16 %v709_v50, %v707_v49  ;;  %v4804_v31 = vpop.permute.xlu0 %553  ;;  %v738_v49 = vld [vmem:[%s6011_s4 + $0x4d8] sm:$0xff] }
 0x2aa   :  { %3335 = vmatprep.subr.bf16.mxu1 %v3334_v59  ;;  %v3366_v59 = vpack.c.bf16 %v714_v53, %v712_v52  ;;  %v735_v53 = vld [vmem:[%s6011_s4 + $0x4c0] sm:$0xff] }
 0x2ad   :  { %3337 = vmatpush1.bf16.msra.mxu1 %v3336_v0  ;;  %v718_v0 = vld [vmem:[%s6011_s4 + $0x438] sm:$0xff] }
 0x2ae   :  { %3339 = vmatprep.subr.bf16.mxu1 %v3338_v1  ;;  %v3780_v1 = vunpack.i.h.bf16 %v3778_v57  ;;  %v3370_v4 = vpack.c.bf16 %v718_v0, %v716_v63  ;;  %v742_v57 = vld [vmem:[%s6011_s4 + $0x4f8] sm:$0xff]  ;;  %v744_v63 = vld [vmem:[%s6011_s4 + $0x508] sm:$0xff] }
 0x2af   :  { %v746_v0 = vld [vmem:[%s6011_s4 + $0x518] sm:$0xff] }
 0x2b0   :  { %v3398_v2 = vpack.c.bf16 %v746_v0, %v744_v63  ;;  %v782_v63 = vld [vmem:[%s6011_s4 + $0x638] sm:$0xff] }
 0x2b1   :  { %3341 = vmatpush1.bf16.msra.mxu1 %v3340_v7  ;;  %v717_v7 = vld [vmem:[%s6011_s4 + $0x430] sm:$0xff] }
 0x2b2   :  { %3343 = vmatprep.subr.bf16.mxu1 %v3342_v8  ;;  %v574_v8 = vsel %vm488_vm7, %v4569_v19, %v3769_v17  ;;  %v450_v19 = vpop.permute.xlu1 %449  ;;  %v491_v17 = vsel %vm488_vm7, %v3779_v9, %v3780_v1  ;;  %v3396_v1 = vpack.c.bf16 %v741_v61, %v739_v60  ;;  %v777_v60 = vld [vmem:[%s6011_s4 + $0x610] sm:$0xff]  ;;  %v780_v61 = vld [vmem:[%s6011_s4 + $0x628] sm:$0xff] }
 0x2b3   :  { %v454_v32 = vsel %vm451_vm6, %v3765_v27, %v450_v19  ;;  %v730_v27 = vld [vmem:[%s6011_s4 + $0x498] sm:$0xff]  ;;  %v3404_v19 = vpack.c.bf16 %v749_v14, %v747_v45 }
 0x2b4   :  { %v576_v37 = vsel %vm488_vm7, %v454_v32, %v3779_v9  ;;  %v762_v32 = vld [vmem:[%s6011_s4 + $0x598] sm:$0xff] }
 0x2b5   :  { %3345 = vmatpush1.bf16.msra.mxu1 %v3344_v20  ;;  %v453_v20 = vsel %vm451_vm6, %v3764_v28, %v446_v42  ;;  %v721_v28 = vld [vmem:[%s6011_s4 + $0x450] sm:$0xff]  ;;  %v734_v42 = vld [vmem:[%s6011_s4 + $0x4b8] sm:$0xff] }
 0x2b6   :  { %3347 = vmatprep.subr.bf16.mxu1 %v3346_v21  ;;  %v3372_v21 = vpack.c.bf16 %v717_v7, %v715_v6  ;;  %v575_v25 = vsel %vm488_vm7, %v453_v20, %v3774_v55  ;;  %v3376_v16 = vpack.c.bf16 %v721_v28, %v719_v23  ;;  %v4815_v35 = vpop.permute.xlu1 %515  ;;  %v3386_v44 = vpack.c.bf16 %v734_v42, %v732_v41  ;;  %v740_v55 = vld [vmem:[%s6011_s4 + $0x4e8] sm:$0xff]  ;;  %v750_v7 = vld [vmem:[%s6011_s4 + $0x538] sm:$0xff] }
 0x2b7   :  { %v580_v38 = vsel %vm111_vm0, %v4815_v35, %v4804_v31  ;;  %v748_v6 = vld [vmem:[%s6011_s4 + $0x528] sm:$0xff]  ;;  %v758_v28 = vld [vmem:[%s6011_s4 + $0x578] sm:$0xff] }
 0x2b8   :  { %v3402_v9 = vpack.c.bf16 %v750_v7, %v748_v6  ;;  %v752_v20 = vld [vmem:[%s6011_s4 + $0x548] sm:$0xff]  ;;  %v770_v41 = vld [vmem:[%s6011_s4 + $0x5d8] sm:$0xff]  ;;  %v781_v6 = vld [vmem:[%s6011_s4 + $0x630] sm:$0xff]  ;;  %v526_v7 = vsel %vm525_vm8, %v4610_v36, %v4815_v35 }
 0x2b9   :  { %3349 = vmatpush1.bf16.msra.mxu1 %v3348_v29  ;;  %v726_v29 = vld [vmem:[%s6011_s4 + $0x478] sm:$0xff]  ;;  %v756_v23 = vld [vmem:[%s6011_s4 + $0x568] sm:$0xff]  ;;  %v783_v36 = vld [vmem:[%s6011_s4 + $0x640] sm:$0xff] }
 0x2ba   :  { %3351 = vmatprep.subr.bf16.mxu1 %v3350_v30  ;;  %v579_v30 = vsel %vm525_vm8, %v491_v17, %v4775_v11  ;;  %v3378_v33 = vpack.c.bf16 %v726_v29, %v724_v26  ;;  %v3410_v26 = vpack.c.bf16 %v758_v28, %v756_v23  ;;  %v755_v29 = vld [vmem:[%s6011_s4 + $0x560] sm:$0xff]  ;;  %v520_v0 = vpop.permute.xlu1 %519  ;;  %v785_v35 = vld [vmem:[%s6011_s4 + $0x650] sm:$0xff] }
 0x2bb   :  { %v3440_v28 = vpack.c.bf16 %v785_v35, %v783_v36 }
 0x2bd   :  { %3353 = vmatpush1.bf16.msra.mxu1 %v3352_v34  ;;  %v723_v34 = vld [vmem:[%s6011_s4 + $0x460] sm:$0xff] }
 0x2be   :  { %3355 = vmatprep.subr.bf16.mxu1 %v3354_v56  ;;  %v725_v56 = vld [vmem:[%s6011_s4 + $0x470] sm:$0xff] }
 0x2bf   :  { %v3380_v39 = vpack.c.bf16 %v725_v56, %v723_v34  ;;  %v759_v56 = vld [vmem:[%s6011_s4 + $0x580] sm:$0xff] }
 0x2c1   :  { %3357 = vmatpush1.bf16.msra.mxu1 %v3356_v51  ;;  %v3382_v51 = vpack.c.bf16 %v730_v27, %v728_v24  ;;  %v764_v24 = vld [vmem:[%s6011_s4 + $0x5a8] sm:$0xff]  ;;  %v766_v27 = vld [vmem:[%s6011_s4 + $0x5b8] sm:$0xff] }
 0x2c2   :  { %3359 = vmatprep.subr.bf16.mxu1 %v3358_v18  ;;  %v727_v18 = vld [vmem:[%s6011_s4 + $0x480] sm:$0xff] }
 0x2c3   :  { %v3384_v43 = vpack.c.bf16 %v729_v40, %v727_v18  ;;  %v765_v18 = vld [vmem:[%s6011_s4 + $0x5b0] sm:$0xff]  ;;  %v768_v40 = vld [vmem:[%s6011_s4 + $0x5c8] sm:$0xff] }
 0x2c5   :  { %3361 = vmatpush1.bf16.msra.mxu1 %v3360_v48  ;;  %v733_v48 = vld [vmem:[%s6011_s4 + $0x4b0] sm:$0xff] }
 0x2c6   :  { %3363 = vmatprep.subr.bf16.mxu1 %v3362_v5  ;;  %v736_v5 = vld [vmem:[%s6011_s4 + $0x4c8] sm:$0xff]  ;;  %v3388_v50 = vpack.c.bf16 %v733_v48, %v731_v47  ;;  %v769_v47 = vld [vmem:[%s6011_s4 + $0x5d0] sm:$0xff] }
 0x2c7   :  { %v3390_v52 = vpack.c.bf16 %v738_v49, %v736_v5  ;;  %v772_v48 = vld [vmem:[%s6011_s4 + $0x5e8] sm:$0xff]  ;;  %v774_v5 = vld [vmem:[%s6011_s4 + $0x5f8] sm:$0xff] }
 0x2c9   :  { %3365 = vmatpush1.bf16.msra.mxu1 %v3364_v58  ;;  %v3392_v58 = vpack.c.bf16 %v737_v54, %v735_v53  ;;  %v773_v53 = vld [vmem:[%s6011_s4 + $0x5f0] sm:$0xff]  ;;  %v776_v54 = vld [vmem:[%s6011_s4 + $0x608] sm:$0xff] }
 0x2ca   :  { %3367 = vmatprep.subr.bf16.mxu1 %v3366_v59  ;;  %v3394_v59 = vpack.c.bf16 %v742_v57, %v740_v55  ;;  %v778_v55 = vld [vmem:[%s6011_s4 + $0x618] sm:$0xff] }
 0x2cc   :  { %960 = vmatmul.mubr.f32.vlgmr.msra.gmra.mrb[8].mxu1 %v574_v8 }
 0x2cd   :  { %965 = vmatprep.mubr.f32.mxu1 %v578_v46  ;;  %3369 = vmatpush1.bf16.msra.mxu1 %v3368_v3  ;;  %v743_v3 = vld [vmem:[%s6011_s4 + $0x500] sm:$0xff]  ;;  %v754_v46 = vld [vmem:[%s6011_s4 + $0x558] sm:$0xff] }
 0x2ce   :  { %3371 = vmatprep.subr.bf16.mxu1 %v3370_v4  ;;  %v745_v4 = vld [vmem:[%s6011_s4 + $0x510] sm:$0xff]  ;;  %v3406_v17 = vpack.c.bf16 %v754_v46, %v752_v20  ;;  %v524_v46 = vpop.permute.xlu1 %523 }
 0x2cf   :  { %v3400_v8 = vpack.c.bf16 %v745_v4, %v743_v3  ;;  %v3434_v3 = vpack.c.bf16 %v782_v63, %v780_v61  ;;  %v779_v4 = vld [vmem:[%s6011_s4 + $0x620] sm:$0xff] }
 0x2d0   :  { %966 = vmatmul.mubr.f32.gmra.mrb[10].mxu1 %v575_v25  ;;  %v3436_v14 = vpack.c.bf16 %v781_v6, %v779_v4 }
 0x2d1   :  { %971 = vmatprep.mubr.f32.mxu1 %v579_v30  ;;  %3373 = vmatpush1.bf16.msra.mxu1 %v3372_v21  ;;  %v751_v21 = vld [vmem:[%s6011_s4 + $0x540] sm:$0xff]  ;;  %v757_v30 = vld [vmem:[%s6011_s4 + $0x570] sm:$0xff] }
 0x2d2   :  { %3375 = vmatprep.subr.bf16.mxu1 %v3374_v22  ;;  %v753_v22 = vld [vmem:[%s6011_s4 + $0x550] sm:$0xff] }
 0x2d3   :  { %v3408_v25 = vpack.c.bf16 %v753_v22, %v751_v21  ;;  %v788_v21 = vld [vmem:[%s6011_s4 + $0x668] sm:$0xff]  ;;  %v790_v22 = vld [vmem:[%s6011_s4 + $0x678] sm:$0xff] }
 0x2d4   :  { %972 = vmatmul.mubr.f32.gmra.mrb[12].mxu1 %v576_v37  ;;  %v761_v37 = vld [vmem:[%s6011_s4 + $0x590] sm:$0xff] }
 0x2d5   :  { %3377 = vmatpush1.bf16.msra.mxu1 %v3376_v16  ;;  %1042 = vmatprep.mubr.f32.mxu1 %v580_v38  ;;  %v760_v16 = vld [vmem:[%s6011_s4 + $0x588] sm:$0xff]  ;;  %v3416_v38 = vpack.c.bf16 %v761_v37, %v759_v56 }
 0x2d6   :  { %3379 = vmatprep.subr.bf16.mxu1 %v3378_v33  ;;  %v3412_v33 = vpack.c.bf16 %v757_v30, %v755_v29  ;;  %v3414_v34 = vpack.c.bf16 %v762_v32, %v760_v16  ;;  %v528_v29 = vsel %vm525_vm8, %v4775_v11, %v524_v46  ;;  %v792_v16 = vld [vmem:[%s6011_s4 + $0x688] sm:$0xff]  ;;  %v556_v32 = vpop.permute.xlu1 %555 }
 0x2d7   :  { %v565_v11 = vsel %vm111_vm0, %v4804_v31, %v556_v32 }
 0x2d9   :  { %3381 = vmatpush1.bf16.msra.mxu1 %v3380_v39  ;;  %v3418_v39 = vpack.c.bf16 %v766_v27, %v764_v24  ;;  %v793_v27 = vld [vmem:[%s6012_s5] sm:$0x3]  ;;  %s3964_s5 = smov 64  }
 0x2da   :  { %3383 = vmatprep.subr.bf16.mxu1 %v3382_v51  ;;  %v763_v51 = vld [vmem:[%s6011_s4 + $0x5a0] sm:$0xff]  ;;  %v564_v37 = vpop.permute.xlu1 %563  ;;  %v798_v31 = vrot.slane %v793_v27, %v103_v13 }
 0x2db   :  { %v3420_v42 = vpack.c.bf16 %v765_v18, %v763_v51 }
 0x2dd   :  { %3385 = vmatpush1.bf16.msra.mxu1 %v3384_v43  ;;  %v3422_v43 = vpack.c.bf16 %v770_v41, %v768_v40 }
 0x2de   :  { %3387 = vmatprep.subr.bf16.mxu1 %v3386_v44  ;;  %v767_v44 = vld [vmem:[%s6011_s4 + $0x5c0] sm:$0xff] }
 0x2df   :  { %v3424_v49 = vpack.c.bf16 %v769_v47, %v767_v44 }
 0x2e1   :  { %3389 = vmatpush1.bf16.msra.mxu1 %v3388_v50  ;;  %v3426_v50 = vpack.c.bf16 %v774_v5, %v772_v48 }
 0x2e2   :  { %3391 = vmatprep.subr.bf16.mxu1 %v3390_v52  ;;  %v771_v52 = vld [vmem:[%s6011_s4 + $0x5e0] sm:$0xff] }
 0x2e3   :  { %v3428_v57 = vpack.c.bf16 %v773_v53, %v771_v52 }
 0x2e5   :  { %3393 = vmatpush1.bf16.msra.mxu1 %v3392_v58  ;;  %v3430_v58 = vpack.c.bf16 %v778_v55, %v776_v54 }
 0x2e6   :  { %3395 = vmatprep.subr.bf16.mxu1 %v3394_v59  ;;  %v775_v59 = vld [vmem:[%s6011_s4 + $0x600] sm:$0xff] }
 0x2e9   :  { %3397 = vmatpush1.bf16.msra.mxu1 %v3396_v1  ;;  %v558_v1 = vpop.permute.xlu0 %557 }
 0x2ea   :  { %3399 = vmatprep.subr.bf16.mxu1 %v3398_v2  ;;  %v3432_v2 = vpack.c.bf16 %v777_v60, %v775_v59  ;;  %v581_v45 = vsel %vm111_vm0, %v520_v0, %v558_v1 }
 0x2ed   :  { %3401 = vmatpush1.bf16.msra.mxu1 %v3400_v8  ;;  %v784_v8 = vld [vmem:[%s6011_s4 + $0x648] sm:$0xff] }
 0x2ee   :  { %3403 = vmatprep.subr.bf16.mxu1 %v3402_v9  ;;  %v786_v9 = vld [vmem:[%s6011_s4 + $0x658] sm:$0xff] }
 0x2ef   :  { %v3438_v20 = vpack.c.bf16 %v786_v9, %v784_v8 }
 0x2f1   :  { %3405 = vmatpush1.bf16.msra.mxu1 %v3404_v19  ;;  %v562_v19 = vpop.permute.xlu0 %561 }
 0x2f2   :  { %3407 = vmatprep.subr.bf16.mxu1 %v3406_v17  ;;  %v527_v17 = vsel %vm525_vm8, %v4756_v62, %v520_v0  ;;  %v582_v23 = vsel %vm111_vm0, %v524_v46, %v562_v19  ;;  %v787_v62 = vld [vmem:[%s6011_s4 + $0x660] sm:$0xff]  ;;  %v567_v24 = vsel %vm111_vm0, %v562_v19, %v564_v37 }
 0x2f5   :  { %3409 = vmatpush1.bf16.msra.mxu1 %v3408_v25  ;;  %v3442_v25 = vpack.c.bf16 %v790_v22, %v788_v21 }
 0x2f6   :  { %3411 = vmatprep.subr.bf16.mxu1 %v3410_v26  ;;  %v789_v26 = vld [vmem:[%s6011_s4 + $0x670] sm:$0xff] }
 0x2f7   :  { %v3444_v30 = vpack.c.bf16 %v789_v26, %v787_v62 }
 0x2f9   :  { %3413 = vmatpush1.bf16.msra.mxu1 %v3412_v33  ;;  %v791_v33 = vld [vmem:[%s6011_s4 + $0x680] sm:$0xff] }
 0x2fa   :  { %3415 = vmatprep.subr.bf16.mxu1 %v3414_v34  ;;  %v560_v34 = vpop.permute.xlu0 %559 }
 0x2fb   :  { %v566_v56 = vsel %vm111_vm0, %v558_v1, %v560_v34 }
 0x2fd   :  { %3417 = vmatpush1.bf16.msra.mxu1 %v3416_v38  ;;  %v802_v38 = vrot.slane %v793_v27, %v107_v15 }
 0x2fe   :  { %3419 = vmatprep.subr.bf16.mxu1 %v3418_v39 }
 0x301   :  { %3421 = vmatpush1.bf16.msra.mxu1 %v3420_v42 }
 0x302   :  { %3423 = vmatprep.subr.bf16.mxu1 %v3422_v43 }
 0x305   :  { %3425 = vmatpush1.bf16.msra.mxu1 %v3424_v49 }
 0x306   :  { %3427 = vmatprep.subr.bf16.mxu1 %v3426_v50 }
 0x309   :  { %3429 = vmatpush1.bf16.msra.mxu1 %v3428_v57 }
 0x30a   :  { %3431 = vmatprep.subr.bf16.mxu1 %v3430_v58 }
 0x30c   :  { %1043 = vmatmul.mubr.f32.vlgmr.msra.gmra.mrb[8].mxu1 %v526_v7 }
 0x30d   :  { %1048 = vmatprep.mubr.f32.mxu1 %v581_v45  ;;  %3433 = vmatpush1.bf16.msra.mxu1 %v3432_v2 }
 0x30e   :  { %3435 = vmatprep.subr.bf16.mxu1 %v3434_v3 }
 0x310   :  { %1049 = vmatmul.mubr.f32.gmra.mrb[10].mxu1 %v527_v17 }
 0x311   :  { %1054 = vmatprep.mubr.f32.mxu1 %v582_v23  ;;  %3437 = vmatpush1.bf16.msra.mxu1 %v3436_v14 }
 0x312   :  { %3439 = vmatprep.subr.bf16.mxu1 %v3438_v20 }
 0x314   :  { %1055 = vmatmul.mubr.f32.gmra.mrb[12].mxu1 %v528_v29 }
 0x315   :  { %3441 = vmatpush1.bf16.msra.mxu1 %v3440_v28  ;;  %1125 = vmatprep.mubr.f32.mxu1 %v3959_v10 }
 0x316   :  { %3443 = vmatprep.subr.bf16.mxu1 %v3442_v25 }
 0x319   :  { %3445 = vmatpush1.bf16.msra.mxu1 %v3444_v30 }
 0x31a   :  { %1077 = vmatprep.subr.mxu1 %v792_v16 }
 0x31d   :  { %1078 = vmatpush1.msra.mxu1 %v791_v33 }
 0x31e   :  { %2822 = vmatmul.mubr.msk.f32.vlgmr.msra.gmra.mrb[8].mxu1 %vm805_vm9, %v565_v11 }
 0x31f   :  { %1131 = vmatprep.mubr.f32.mxu1 %v3959_v10 }
 0x322   :  { %2823 = vmatmul.mubr.msk.f32.gmra.mrb[10].mxu1 %vm805_vm9, %v566_v56 }
 0x323   :  { %1137 = vmatprep.mubr.f32.mxu1 %v3959_v10 }
 0x326   :  { %2824 = vmatmul.mubr.msk.f32.gmra.mrb[12].mxu1 %vm805_vm9, %v567_v24 }
 0x3f1   :  { %v1127_v39 = vpop.f32.mrb[8].mxu1 }
 0x3f2   :  { %v3726_v51 = vadd.f32 %v1127_v39, %v798_v31  ;;  %v1129_v18 = vpop.f32.mrb[9].mxu1 }
 0x3f3   :  { %v3727_v40 = vadd.f32 %v1129_v18, %v802_v38 }
 0x3f4   :  { %v1144_v41 = vsub.f32 0.0, %v3726_v51 }
 0x3f5   :  { %v1145_v42 = vsub.f32 0.0, %v3727_v40  ;;  %v1133_v43 = vpop.f32.mrb[10].mxu1 }
 0x3f6   :  { %v1150_v44 = vmul.f32 1.442695, %v1144_v41  ;;  %v3728_v47 = vadd.f32 %v1133_v43, %v798_v31  ;;  %v1135_v48 = vpop.f32.mrb[11].mxu1 }
 0x3f7   :  { %v1152_v5 = vmul.f32 1.442695, %v1145_v42  ;;  %v3729_v49 = vadd.f32 %v1135_v48, %v802_v38 }
 0x3f8   :  { %3907 = vpow2.f32 %v1150_v44  ;;  %v1146_v50 = vsub.f32 0.0, %v3728_v47 }
 0x3f9   :  { %3909 = vpow2.f32 %v1152_v5  ;;  %v1147_v52 = vsub.f32 0.0, %v3729_v49  ;;  %v1139_v13 = vpop.f32.mrb[12].mxu1 }
 0x3fa   :  { %v1154_v53 = vmul.f32 1.442695, %v1146_v50  ;;  %v3730_v12 = vadd.f32 %v1139_v13, %v798_v31  ;;  %v1141_v15 = vpop.f32.mrb[13].mxu1 }
 0x3fb   :  { %v1156_v54 = vmul.f32 1.442695, %v1147_v52  ;;  %v3731_v55 = vadd.f32 %v1141_v15, %v802_v38 }
 0x3fc   :  { %3911 = vpow2.f32 %v1154_v53  ;;  %v1148_v57 = vsub.f32 0.0, %v3730_v12 }
 0x3fd   :  { %3913 = vpow2.f32 %v1156_v54  ;;  %v1149_v58 = vsub.f32 0.0, %v3731_v55 }
 0x3fe   :  { %v1158_v59 = vmul.f32 1.442695, %v1148_v57 }
 0x3ff   :  { %v1160_v60 = vmul.f32 1.442695, %v1149_v58 }
 0x400   :  { %3915 = vpow2.f32 %v1158_v59 }
 0x401   :  { %3917 = vpow2.f32 %v1160_v60 }
 0x402   :  { %v3908_v61 = vpop.eup %3907 }
 0x403   :  { %v3910_v63 = vpop.eup %3909  ;;  %v1162_v0 = vadd.f32 1.0, %v3908_v61 }
 0x404   :  { %v1163_v1 = vadd.f32 1.0, %v3910_v63 }
 0x405   :  { %3919 = vrcp.f32 %v1162_v0 }
 0x406   :  { %v3912_v2 = vpop.eup %3911  ;;  %3921 = vrcp.f32 %v1163_v1 }
 0x407   :  { %v3914_v3 = vpop.eup %3913  ;;  %v1164_v4 = vadd.f32 1.0, %v3912_v2 }
 0x408   :  { %v1165_v6 = vadd.f32 1.0, %v3914_v3 }
 0x409   :  { %3923 = vrcp.f32 %v1164_v4 }
 0x40a   :  { %v3916_v7 = vpop.eup %3915  ;;  %3925 = vrcp.f32 %v1165_v6 }
 0x40b   :  { %v3918_v8 = vpop.eup %3917  ;;  %v1166_v9 = vadd.f32 1.0, %v3916_v7 }
 0x40c   :  { %v1167_v45 = vadd.f32 1.0, %v3918_v8 }
 0x40d   :  { %3927 = vrcp.f32 %v1166_v9 }
 0x40e   :  { %3929 = vrcp.f32 %v1167_v45 }
 0x40f   :  { %v5042_v14 = vpop.eup %3919 }
 0x410   :  { %v5044_v20 = vpop.eup %3921  ;;  %v1178_v35 = vrot.slane %v5042_v14, 1  ;;  %v1200_v46 = vrot.slane %v5042_v14, 2  ;;  %v1225_v19 = vrot.slane %v5042_v14, 3  ;;  %v1263_v17 = vrot.slane %v5042_v14, 5 }
 0x411   :  { %v1203_v62 = vrot.slane %v5044_v20, 2  ;;  %v1181_v37 = vrot.slane %v5044_v20, 1  ;;  %v1228_v13 = vrot.slane %v5044_v20, 3  ;;  %v1266_v12 = vrot.slane %v5044_v20, 5 }
 0x412   :  { %v1288_v15 = vrot.slane %v5042_v14, 6  ;;  %v1313_v55 = vrot.slane %v5042_v14, 7  ;;  %v1291_v8 = vrot.slane %v5044_v20, 6 }
 0x413   :  { %v5046_v36 = vpop.eup %3923 }
 0x414   :  { %v5052_v21 = vpop.eup %3925  ;;  %v5055_v22 = vrot.slane %v5046_v36, 1  ;;  %v1201_v23 = vrot.slane %v5046_v36, 2  ;;  %v1226_v28 = vrot.slane %v5046_v36, 3  ;;  %v1264_v25 = vrot.slane %v5046_v36, 5 }
 0x415   :  { %v1204_v26 = vrot.slane %v5052_v21, 2  ;;  %v5063_v29 = vrot.slane %v5052_v21, 1  ;;  %v1229_v42 = vrot.slane %v5052_v21, 3  ;;  %v1267_v44 = vrot.slane %v5052_v21, 5 }
 0x416   :  { %v1180_v30 = vsel %vm424_vm2, %v1178_v35, %v5055_v22  ;;  %v1202_v16 = vsel %vm461_vm3, %v1200_v46, %v1201_v23  ;;  %v1227_v32 = vsel %vm498_vm4, %v1225_v19, %v1226_v28  ;;  %v5070_v33 = vsel %vm1262_vm10, %v1263_v17, %v1264_v25 }
 0x417   :  { %v5072_v11 = vpop.eup %3927  ;;  %v3781_v34 = vpack.i.bf16 %v5055_v22, %v1180_v30  ;;  %v1205_v56 = vsel %vm461_vm3, %v1203_v62, %v1204_v26  ;;  %v1183_v39 = vsel %vm424_vm2, %v1181_v37, %v5063_v29  ;;  %v1289_v54 = vrot.slane %v5046_v36, 6 }
 0x418   :  { %v5077_v24 = vpop.eup %3929  ;;  %v3786_v27 = vpack.i.bf16 %v1205_v56, %v1202_v16  ;;  %v1206_v31 = vrot.slane %v5072_v11, 2  ;;  %v1231_v38 = vrot.slane %v5072_v11, 3  ;;  %v1269_v40 = vrot.slane %v5072_v11, 5 }
 0x419   :  { %3782 = vrot.lane.b32.xlu0 %v3781_v34, %s3963_s3  ;;  %v1208_v51 = vrot.slane %v5077_v24, 2  ;;  %v1233_v18 = vrot.slane %v5077_v24, 3  ;;  %v1271_v49 = vrot.slane %v5077_v24, 5  ;;  %v3791_v50 = vpack.i.bf16 %v5063_v29, %v1183_v39 }
 0x41a   :  { %3787 = vrot.lane.b32.xlu1 %v3786_v27, %s3964_s5  ;;  %v1207_v41 = vsel %vm461_vm3, %v1201_v23, %v1206_v31  ;;  %v1232_v43 = vsel %vm498_vm4, %v1226_v28, %v1231_v38  ;;  %v1270_v5 = vsel %vm1262_vm10, %v1264_v25, %v1269_v40  ;;  %v1230_v57 = vsel %vm498_vm4, %v1228_v13, %v1229_v42 }
 0x41b   :  { %v1209_v47 = vsel %vm461_vm3, %v1204_v26, %v1208_v51  ;;  %v3801_v48 = vpack.i.bf16 %v1232_v43, %v1227_v32  ;;  %v1234_v53 = vsel %vm498_vm4, %v1229_v42, %v1233_v18  ;;  %v1294_v58 = vrot.slane %v5072_v11, 6 }
 0x41c   :  { %v3796_v52 = vpack.i.bf16 %v1209_v47, %v1207_v41  ;;  %v1314_v59 = vrot.slane %v5046_v36, 7  ;;  %v1319_v60 = vrot.slane %v5072_v11, 7  ;;  %v3806_v61 = vpack.i.bf16 %v1234_v53, %v1230_v57 }
 0x41d   :  { %v1272_v63 = vsel %vm1262_vm10, %v1267_v44, %v1271_v49  ;;  %v1268_v0 = vsel %vm1262_vm10, %v1266_v12, %v1267_v44  ;;  %v1290_v1 = vsel %vm1287_vm11, %v1288_v15, %v1289_v54  ;;  %v1296_v2 = vrot.slane %v5077_v24, 6 }
 0x41e   :  { %3792 = vrot.lane.b32.xlu1 %v3791_v50, %s3963_s3  ;;  %3797 = vrot.lane.b32.xlu0 %v3796_v52, %s3964_s5  ;;  %v1295_v3 = vsel %vm1287_vm11, %v1289_v54, %v1294_v58  ;;  %v1320_v4 = vsel %vm1312_vm12, %v1314_v59, %v1319_v60  ;;  %v1315_v6 = vsel %vm1312_vm12, %v1313_v55, %v1314_v59  ;;  %v1292_v9 = vrot.slane %v5052_v21, 6  ;;  %v5172_v55 = vld [vmem:[%s6013_s6] sm:$0x3] }
 0x41f   :  { %v3821_v7 = vpack.i.bf16 %v1295_v3, %v1290_v1  ;;  %v1336_v45 = vrot.slane %v5072_v11, 1  ;;  %v3816_v35 = vpack.i.bf16 %v1272_v63, %v1270_v5  ;;  %v3811_v46 = vpack.i.bf16 %v1268_v0, %v5070_v33 }
 0x420   :  { %v3449_v19 = vpack.c.bf16 %v5046_v36, %v5042_v14  ;;  %v1249_v17 = vrot.slane %v5042_v14, 4  ;;  %v1297_v23 = vsel %vm1287_vm11, %v1292_v9, %v1296_v2  ;;  %v1317_v28 = vrot.slane %v5052_v21, 7 }
 0x421   :  { %v1337_v25 = vsel %vm424_vm2, %v5055_v22, %v1336_v45  ;;  %v1250_v62 = vrot.slane %v5046_v36, 4  ;;  %v1321_v26 = vrot.slane %v5077_v24, 7  ;;  %v1255_v16 = vrot.slane %v5072_v11, 4 }
 0x422   :  { %3807 = vrot.lane.b32.xlu1 %v3806_v61, %s3965_s18  ;;  %3802 = vrot.lane.b32.xlu0 %v3801_v48, %s3965_s18  ;;  %v3841_v30 = vpack.i.bf16 %v1336_v45, %v1337_v25  ;;  %v3479_v32 = vpack.c.bf16 %v5072_v11, %v5046_v36  ;;  %v1293_v33 = vsel %vm1287_vm11, %v1291_v8, %v1292_v9  ;;  %v1316_v22 = vrot.slane %v5044_v20, 7  ;;  %v1919_v36 = vld [vmem:[%s6014_s7 + $0x90] sm:$0xff]  ;;  %v1920_v11 = vld [vmem:[%s6014_s7 + $0x98] sm:$0xff] }
 0x423   :  { %v5136_v14 = vsel %vm538_vm5, %v1249_v17, %v1250_v62  ;;  %v5141_v34 = vsel %vm538_vm5, %v1250_v62, %v1255_v16  ;;  %v3831_v56 = vpack.i.bf16 %v1297_v23, %v1293_v33  ;;  %v1322_v27 = vsel %vm1312_vm12, %v1317_v28, %v1321_v26 }
 0x424   :  { %v3458_v37 = vpack.c.bf16 %v5141_v34, %v5136_v14  ;;  %v1318_v31 = vsel %vm1312_vm12, %v1316_v22, %v1317_v28  ;;  %v1338_v38 = vrot.slane %v5077_v24, 1  ;;  %v3836_v39 = vpack.i.bf16 %v1322_v27, %v1320_v4 }
 0x425   :  { %v3826_v51 = vpack.i.bf16 %v1318_v31, %v1315_v6  ;;  %v1253_v45 = vrot.slane %v5052_v21, 4  ;;  %v1252_v62 = vrot.slane %v5044_v20, 4  ;;  %vm2719_vm3 = vcmask 687104  }
 0x426   :  { %3817 = vrot.lane.b32.xlu1 %v3816_v35, %s3963_s3  ;;  %3812 = vrot.lane.b32.xlu0 %v3811_v46, %s3963_s3  ;;  %v1339_v18 = vsel %vm424_vm2, %v5063_v29, %v1338_v38  ;;  %vm1243_vm2 = vcmask 785408   ;;  %v1257_v46 = vrot.slane %v5077_v24, 4  ;;  %v1921_v29 = vld [vmem:[%s6014_s7 + $0xa0] sm:$0xff] }
 0x427   :  { %v3846_v40 = vpack.i.bf16 %v1338_v38, %v1339_v18  ;;  %v1254_v22 = vsel %vm538_vm5, %v1252_v62, %v1253_v45 }
 0x42a   :  { %3832 = vrot.lane.b32.xlu1 %v3831_v56, %s3964_s5  ;;  %3822 = vrot.lane.b32.xlu0 %v3821_v7, %s3964_s5  ;;  %v1258_v56 = vsel %vm538_vm5, %v1253_v45, %v1257_v46  ;;  %v1901_v45 = vld [vmem:[%s6014_s7] sm:$0xff]  ;;  %s3969_s5 = smov [#allocation2]  }
 0x42e   :  { %3837 = vrot.lane.b32.xlu1 %v3836_v39, %s3965_s18  ;;  %3827 = vrot.lane.b32.xlu0 %v3826_v51, %s3965_s18  ;;  %s2803_s18 = sshll.u32 %s3969_s5, 4  ;;  %s2804_s18 = int_to_ptr.vmem [resolvable:$true] %s2803_s18 }
 0x42f   :  { %p3940_p1 = scmp.lt.s32.totalorder %s2804_s18, %s2804_s18 }
 0x432   :  { %3847 = vrot.lane.b32.xlu1 %v3846_v40, %s3963_s3  ;;  %3842 = vrot.lane.b32.xlu0 %v3841_v30, %s3963_s3 }
 0x48b   :  { %v3783_v41 = vpop.permute.xlu0 %3782 }
 0x48c   :  { %v3785_v42 = vunpack.i.h.bf16 %v3783_v41  ;;  %v3784_v43 = vunpack.i.l.bf16 %v3783_v41  ;;  %v3788_v44 = vpop.permute.xlu1 %3787 }
 0x48d   :  { %v3790_v52 = vunpack.i.h.bf16 %v3788_v44  ;;  %v3789_v13 = vunpack.i.l.bf16 %v3788_v44 }
 0x48e   :  { %v1354_v47 = vsel %vm111_vm0, %v5052_v21, %v3785_v42  ;;  %v1353_v48 = vsel %vm111_vm0, %v5044_v20, %v3784_v43 }
 0x48f   :  { %v3446_v5 = vpack.c.bf16 %v1354_v47, %v1353_v48  ;;  %v1219_v61 = vsel %vm1218_vm15, %v3789_v13, %v3790_v52 }
 0x490   :  { %v3798_v49 = vpop.permute.xlu0 %3797  ;;  %v3793_v50 = vpop.permute.xlu1 %3792 }
 0x491   :  { %v3795_v53 = vunpack.i.h.bf16 %v3793_v50  ;;  %v3794_v12 = vunpack.i.l.bf16 %v3793_v50  ;;  %3448 = vmatprep.subr.msk.bf16.mxu0 %vm5161_vm14, %v3446_v5  ;;  %v3800_v15 = vunpack.i.h.bf16 %v3798_v49  ;;  %v3799_v54 = vunpack.i.l.bf16 %v3798_v49 }
 0x492   :  { %3451 = vmatpush1.bf16.msk.msra.mxu0 %vm5161_vm14, %v3449_v19 }
 0x493   :  { %v1193_v57 = vsel %vm111_vm0, %v3785_v42, %v3795_v53  ;;  %v1192_v58 = vsel %vm111_vm0, %v3784_v43, %v3794_v12  ;;  %v1220_v2 = vsel %vm1218_vm15, %v3799_v54, %v3800_v15 }
 0x494   :  { %v3803_v59 = vpop.permute.xlu0 %3802  ;;  %v3808_v60 = vpop.permute.xlu1 %3807  ;;  %v1356_v3 = vsel %vm1218_vm15, %v1193_v57, %v3799_v54  ;;  %v1355_v4 = vsel %vm1218_vm15, %v1192_v58, %v3789_v13 }
 0x495   :  { %v3805_v63 = vunpack.i.h.bf16 %v3803_v59  ;;  %v3804_v0 = vunpack.i.l.bf16 %v3803_v59  ;;  %v3810_v1 = vunpack.i.h.bf16 %v3808_v60  ;;  %2827 = vmatmul.mubr.msk.f32.vlgmr.msra.gmra.mrb[14].mxu0 %vm1368_vm1, %v5172_v55  ;;  %v3809_v6 = vunpack.i.l.bf16 %v3808_v60 }
 0x496   :  { %1540 = vmatprep.mubr.f32.mxu0 %v3959_v10  ;;  %v3455_v17 = vpack.c.bf16 %v1356_v3, %v1355_v4 }
 0x497   :  { %v1357_v7 = vsel %vm1243_vm2, %v1219_v61, %v3804_v0  ;;  %v1358_v8 = vsel %vm1243_vm2, %v1220_v2, %v3805_v63  ;;  %v1245_v23 = vsel %vm1243_vm2, %v3805_v63, %v3810_v1  ;;  %v1244_v28 = vsel %vm1243_vm2, %v3804_v0, %v3809_v6  ;;  %v1917_v6 = vld [vmem:[%s6014_s7 + $0x80] sm:$0xff] }
 0x498   :  { %v3452_v9 = vpack.c.bf16 %v1358_v8, %v1357_v7  ;;  %v3813_v35 = vpop.permute.xlu0 %3812  ;;  %v3818_v19 = vpop.permute.xlu1 %3817  ;;  %v3461_v33 = vpack.c.bf16 %v1245_v23, %v1244_v28  ;;  %v1918_v7 = vld [vmem:[%s6014_s7 + $0x88] sm:$0xff]  ;;  %v1904_v23 = vld [vmem:[%s6014_s7 + $0x18] sm:$0xff] }
 0x499   :  { %v3814_v25 = vunpack.i.l.bf16 %v3813_v35  ;;  %v3815_v26 = vunpack.i.h.bf16 %v3813_v35  ;;  %v3820_v30 = vunpack.i.h.bf16 %v3818_v19  ;;  %v3819_v16 = vunpack.i.l.bf16 %v3818_v19  ;;  %v1902_v35 = vld [vmem:[%s6014_s7 + $0x8] sm:$0xff] }
 0x49a   :  { %3454 = vmatprep.subr.msk.bf16.mxu0 %vm5161_vm14, %v3452_v9  ;;  %v3486_v9 = vpack.c.bf16 %v1918_v7, %v1917_v6  ;;  %v3490_v19 = vpack.c.bf16 %v1920_v11, %v1919_v36  ;;  %v1922_v28 = vld [vmem:[%s6014_s7 + $0xa8] sm:$0xff]  ;;  %v2063_v6 = vld [vmem:[%s6014_s7 + $0x510] sm:$0xff] }
 0x49b   :  { %3457 = vmatpush1.bf16.msk.msra.mxu0 %vm5161_vm14, %v3455_v17  ;;  %v1359_v20 = vsel %vm111_vm0, %v1254_v22, %v3814_v25  ;;  %v1360_v38 = vsel %vm111_vm0, %v1258_v56, %v3819_v16  ;;  %v1281_v18 = vsel %vm111_vm0, %v3814_v25, %v3815_v26  ;;  %v1282_v40 = vsel %vm111_vm0, %v3819_v16, %v3820_v30  ;;  %v1903_v17 = vld [vmem:[%s6014_s7 + $0x10] sm:$0xff]  ;;  %v1905_v26 = vld [vmem:[%s6014_s7 + $0x20] sm:$0xff]  ;;  %v1906_v30 = vld [vmem:[%s6014_s7 + $0x28] sm:$0xff] }
 0x49c   :  { %v3823_v27 = vpop.permute.xlu0 %3822  ;;  %v3833_v31 = vpop.permute.xlu1 %3832  ;;  %3460 = vmatprep.subr.msk.bf16.mxu0 %vm5161_vm14, %v3458_v37  ;;  %v3467_v37 = vpack.c.bf16 %v1360_v38, %v1359_v20  ;;  %v3492_v25 = vpack.c.bf16 %v1904_v23, %v1903_v17  ;;  %v3494_v62 = vpack.c.bf16 %v1922_v28, %v1921_v29  ;;  %v1923_v16 = vld [vmem:[%s6014_s7 + $0xb0] sm:$0xff]  ;;  %v1926_v20 = vld [vmem:[%s6014_s7 + $0xc8] sm:$0xff]  ;;  %v2068_v29 = vld [vmem:[%s6014_s7 + $0x538] sm:$0xff] }
 0x49d   :  { %v3825_v39 = vunpack.i.h.bf16 %v3823_v27  ;;  %v3824_v51 = vunpack.i.l.bf16 %v3823_v27  ;;  %v3835_v41 = vunpack.i.h.bf16 %v3833_v31  ;;  %v3834_v42 = vunpack.i.l.bf16 %v3833_v31  ;;  %v1907_v56 = vld [vmem:[%s6014_s7 + $0x30] sm:$0xff]  ;;  %v1908_v27 = vld [vmem:[%s6014_s7 + $0x38] sm:$0xff]  ;;  %v1925_v31 = vld [vmem:[%s6014_s7 + $0xc0] sm:$0xff] }
 0x49e   :  { %2830 = vmatmul.mubr.msk.f32.vlgmr.msra.gmra.mrb[16].mxu0 %vm1368_vm1, %v5172_v55  ;;  %v3500_v38 = vpack.c.bf16 %v1908_v27, %v1907_v56  ;;  %v2066_v36 = vld [vmem:[%s6014_s7 + $0x528] sm:$0xff]  ;;  %v2067_v17 = vld [vmem:[%s6014_s7 + $0x530] sm:$0xff] }
 0x49f   :  { %v1361_v14 = vsel %vm1218_vm15, %v1281_v18, %v3824_v51  ;;  %v1362_v34 = vsel %vm1218_vm15, %v1282_v40, %v3825_v39  ;;  %3463 = vmatpush1.bf16.msk.msra.mxu0 %vm5161_vm14, %v3461_v33  ;;  %1611 = vmatprep.mubr.f32.mxu0 %v3959_v10  ;;  %v1307_v52 = vsel %vm1218_vm15, %v3825_v39, %v3835_v41  ;;  %v1910_v18 = vld [vmem:[%s6014_s7 + $0x48] sm:$0xff]  ;;  %v1927_v40 = vld [vmem:[%s6014_s7 + $0xd0] sm:$0xff]  ;;  %v1928_v41 = vld [vmem:[%s6014_s7 + $0xd8] sm:$0xff] }
 0x4a0   :  { %v3464_v43 = vpack.c.bf16 %v1362_v34, %v1361_v14  ;;  %v3828_v44 = vpop.permute.xlu0 %3827  ;;  %v3838_v47 = vpop.permute.xlu1 %3837  ;;  %v1306_v13 = vsel %vm1218_vm15, %v3824_v51, %v3834_v42  ;;  %v3496_v33 = vpack.c.bf16 %v1906_v30, %v1905_v26  ;;  %v3502_v39 = vpack.c.bf16 %v1926_v20, %v1925_v31  ;;  %v1909_v51 = vld [vmem:[%s6014_s7 + $0x40] sm:$0xff]  ;;  %v1911_v34 = vld [vmem:[%s6014_s7 + $0x50] sm:$0xff]  ;;  %v2072_v31 = vld [vmem:[%s6014_s7 + $0x558] sm:$0xff] }
 0x4a1   :  { %v3830_v48 = vunpack.i.h.bf16 %v3828_v44  ;;  %v3829_v5 = vunpack.i.l.bf16 %v3828_v44  ;;  %v3840_v49 = vunpack.i.h.bf16 %v3838_v47  ;;  %v3839_v50 = vunpack.i.l.bf16 %v3838_v47  ;;  %v1930_v44 = vld [vmem:[%s6014_s7 + $0xe8] sm:$0xff]  ;;  %v2069_v26 = vld [vmem:[%s6014_s7 + $0x540] sm:$0xff]  ;;  %v2071_v56 = vld [vmem:[%s6014_s7 + $0x550] sm:$0xff] }
 0x4a2   :  { %3466 = vmatprep.subr.msk.bf16.mxu0 %vm5161_vm14, %v3464_v43  ;;  %2833 = vmatmul.mubr.msk.f32.vlgmr.msra.gmra.mrb[18].mxu0 %vm1368_vm1, %v5172_v55  ;;  %v3504_v42 = vpack.c.bf16 %v1910_v18, %v1909_v51  ;;  %v3506_v14 = vpack.c.bf16 %v1928_v41, %v1927_v40  ;;  %v1929_v43 = vld [vmem:[%s6014_s7 + $0xe0] sm:$0xff]  ;;  %v3660_v28 = vpack.c.bf16 %v2068_v29, %v2067_v17  ;;  %v1934_v40 = vld [vmem:[%s6014_s7 + $0x108] sm:$0xff]  ;;  %v1943_v29 = vld [vmem:[%s6014_s7 + $0x150] sm:$0xff] }
 0x4a3   :  { %v1331_v53 = vsel %vm1243_vm2, %v3829_v5, %v3830_v48  ;;  %v1363_v12 = vsel %vm1243_vm2, %v1306_v13, %v3829_v5  ;;  %v1332_v15 = vsel %vm1243_vm2, %v3839_v50, %v3840_v49  ;;  %v1364_v54 = vsel %vm1243_vm2, %v1307_v52, %v3839_v50  ;;  %3469 = vmatpush1.bf16.msk.msra.mxu0 %vm5161_vm14, %v3467_v37  ;;  %v1912_v37 = vld [vmem:[%s6014_s7 + $0x58] sm:$0xff]  ;;  %v1913_v5 = vld [vmem:[%s6014_s7 + $0x60] sm:$0xff]  ;;  %v1914_v49 = vld [vmem:[%s6014_s7 + $0x68] sm:$0xff] }
 0x4a4   :  { %v3470_v57 = vpack.c.bf16 %v1332_v15, %v1331_v53  ;;  %v3473_v58 = vpack.c.bf16 %v1364_v54, %v1363_v12  ;;  %v3843_v59 = vpop.permute.xlu0 %3842  ;;  %v3848_v60 = vpop.permute.xlu1 %3847  ;;  %1682 = vmatprep.mubr.f32.mxu0 %v3959_v10  ;;  %v3508_v47 = vpack.c.bf16 %v1912_v37, %v1911_v34  ;;  %v3510_v48 = vpack.c.bf16 %v1930_v44, %v1929_v43  ;;  %v1931_v50 = vld [vmem:[%s6014_s7 + $0xf0] sm:$0xff]  ;;  %v1932_v52 = vld [vmem:[%s6014_s7 + $0xf8] sm:$0xff]  ;;  %v2073_v51 = vld [vmem:[%s6014_s7 + $0x560] sm:$0xff] }
 0x4a5   :  { %v3845_v61 = vunpack.i.h.bf16 %v3843_v59  ;;  %v3844_v63 = vunpack.i.l.bf16 %v3843_v59  ;;  %v3850_v0 = vunpack.i.h.bf16 %v3848_v60  ;;  %v3849_v1 = vunpack.i.l.bf16 %v3848_v60  ;;  %v1915_v12 = vld [vmem:[%s6014_s7 + $0x70] sm:$0xff]  ;;  %v1916_v15 = vld [vmem:[%s6014_s7 + $0x78] sm:$0xff]  ;;  %v2077_v60 = vld [vmem:[%s6014_s7 + $0x580] sm:$0xff] }
 0x4a6   :  { %3472 = vmatprep.subr.msk.bf16.mxu0 %vm5161_vm14, %v3470_v57  ;;  %2836 = vmatmul.mubr.msk.f32.vlgmr.msra.gmra.mrb[20].mxu0 %vm1368_vm1, %v5172_v55  ;;  %v3512_v13 = vpack.c.bf16 %v1914_v49, %v1913_v5  ;;  %v3514_v53 = vpack.c.bf16 %v1932_v52, %v1931_v50  ;;  %v3516_v54 = vpack.c.bf16 %v1916_v15, %v1915_v12  ;;  %v1949_v57 = vld [vmem:[%s6014_s7 + $0x180] sm:$0xff]  ;;  %v1952_v34 = vld [vmem:[%s6014_s7 + $0x198] sm:$0xff]  ;;  %v2075_v5 = vld [vmem:[%s6014_s7 + $0x570] sm:$0xff] }
 0x4a7   :  { %v1366_v2 = vsel %vm111_vm0, %v5077_v24, %v3845_v61  ;;  %v1365_v3 = vsel %vm111_vm0, %v5052_v21, %v3844_v63  ;;  %3475 = vmatpush1.bf16.msk.msra.mxu0 %vm5161_vm14, %v3473_v58  ;;  %1753 = vmatprep.mubr.f32.mxu0 %v3959_v10  ;;  %v1349_v8 = vsel %vm111_vm0, %v3845_v61, %v3850_v0  ;;  %v3967_v21 = vmov 0.0|0.0   ;;  %v1950_v58 = vld [vmem:[%s6014_s7 + $0x188] sm:$0xff]  ;;  %v2061_v0 = vld [vmem:[%s6014_s7 + $0x500] sm:$0xff]  ;;  %v1935_v52 = vld [vmem:[%s6014_s7 + $0x110] sm:$0xff] }
 0x4a8   :  { %v3476_v4 = vpack.c.bf16 %v1366_v2, %v1365_v3  ;;  %v1348_v24 = vsel %vm111_vm0, %v3844_v63, %v3849_v1  ;;  %vm3968_vm0 = vmmov 0   ;;  %v3518_v59 = vpack.c.bf16 %v1950_v58, %v1949_v57  ;;  %v2078_v61 = vld [vmem:[%s6014_s7 + $0x588] sm:$0xff]  ;;  %v2079_v3 = vld [vmem:[%s6014_s7 + $0x590] sm:$0xff]  ;;  %v1933_v18 = vld [vmem:[%s6014_s7 + $0x100] sm:$0xff] }
 0x4a9   :  { %v3483_v46 = vpack.c.bf16 %v1349_v8, %v1348_v24  ;;  %v3646_v63 = vpack.c.bf16 %v2078_v61, %v2077_v60  ;;  %v2062_v1 = vld [vmem:[%s6014_s7 + $0x508] sm:$0xff]  ;;  %v2064_v8 = vld [vmem:[%s6014_s7 + $0x518] sm:$0xff]  ;;  %v3668_v20 = vpack.c.bf16 %v2072_v31, %v2071_v56  ;;  %v3520_v44 = vpack.c.bf16 %v1934_v40, %v1933_v18  ;;  %v1953_v15 = vld [vmem:[%s6014_s7 + $0x1a0] sm:$0xff] }
 0x4aa   :  { %3478 = vmatprep.subr.msk.bf16.mxu0 %vm5161_vm14, %v3476_v4  ;;  %2839 = vmatmul.mubr.msk.f32.vlgmr.msra.gmra.mrb[22].mxu0 %vm1368_vm1, %v5172_v55  ;;  %v3648_v2 = vpack.c.bf16 %v2062_v1, %v2061_v0  ;;  %v2080_v4 = vld [vmem:[%s6014_s7 + $0x598] sm:$0xff]  ;;  %v3652_v24 = vpack.c.bf16 %v2064_v8, %v2063_v6  ;;  %v1937_v60 = vld [vmem:[%s6014_s7 + $0x120] sm:$0xff]  ;;  %v1938_v61 = vld [vmem:[%s6014_s7 + $0x128] sm:$0xff] }
 0x4ab   :  { %3481 = vmatpush1.bf16.msk.msra.mxu0 %vm5161_vm14, %v3479_v32  ;;  %1824 = vmatprep.mubr.f32.mxu0 %v3959_v10  ;;  %v3488_v32 = vpack.c.bf16 %v1902_v35, %v1901_v45  ;;  %v3650_v7 = vpack.c.bf16 %v2080_v4, %v2079_v3  ;;  %v2082_v45 = vld [vmem:[%s6014_s7 + $0x5a8] sm:$0xff]  ;;  %v2065_v35 = vld [vmem:[%s6014_s7 + $0x520] sm:$0xff]  ;;  %v2076_v12 = vld [vmem:[%s6014_s7 + $0x578] sm:$0xff]  ;;  %v3528_v1 = vpack.c.bf16 %v1938_v61, %v1937_v60 }
 0x4ac   :  { %3482 = vmatprep.subr.bf16.mxu0 %v3967_v21  ;;  %3647 = vmatprep.subr.bf16.mxu1 %v3646_v63  ;;  %v3656_v11 = vpack.c.bf16 %v2066_v36, %v2065_v35  ;;  %v3676_v57 = vpack.c.bf16 %v2076_v12, %v2075_v5  ;;  %v1955_v63 = vld [vmem:[%s6014_s7 + $0x1b0] sm:$0xff]  ;;  %v1956_v0 = vld [vmem:[%s6014_s7 + $0x1b8] sm:$0xff]  ;;  %v1958_v8 = vld [vmem:[%s6014_s7 + $0x1c8] sm:$0xff] }
 0x4ad   :  { %3649 = vmatpush3.bf16.msra.mxu1 %v3648_v2  ;;  %v3530_v2 = vpack.c.bf16 %v1956_v0, %v1955_v63  ;;  %v1939_v3 = vld [vmem:[%s6014_s7 + $0x130] sm:$0xff]  ;;  %v1940_v4 = vld [vmem:[%s6014_s7 + $0x138] sm:$0xff]  ;;  %v1941_v35 = vld [vmem:[%s6014_s7 + $0x140] sm:$0xff] }
 0x4ae   :  { %2842 = vmatmul.mubr.msk.f32.vlgmr.msra.gmra.mrb[24].mxu0 %vm1368_vm1, %v5172_v55  ;;  %3651 = vmatprep.subr.bf16.mxu1 %v3650_v7  ;;  %v1957_v7 = vld [vmem:[%s6014_s7 + $0x1c0] sm:$0xff]  ;;  %v1964_v31 = vld [vmem:[%s6014_s7 + $0x1f8] sm:$0xff]  ;;  %v1987_v60 = vld [vmem:[%s6014_s7 + $0x2b0] sm:$0xff] }
 0x4af   :  { %3485 = vmatpush3.bf16.msk.msra.mxu0 %vm5161_vm14, %v3483_v46  ;;  %3106 = vmatprep.mubr.msk.f32.mxu0 %vm3968_vm0, %v3959_v10  ;;  %v1948_v18 = vld [vmem:[%s6014_s7 + $0x178] sm:$0xff]  ;;  %v1985_v12 = vld [vmem:[%s6014_s7 + $0x2a0] sm:$0xff] }
 0x4b0   :  { %3487 = vmatprep.subr.bf16.mxu0 %v3486_v9  ;;  %v2081_v9 = vld [vmem:[%s6014_s7 + $0x5a0] sm:$0xff]  ;;  %v1984_v5 = vld [vmem:[%s6014_s7 + $0x298] sm:$0xff] }
 0x4b1   :  { %3653 = vmatpush3.bf16.msra.mxu1 %v3652_v24  ;;  %v3654_v46 = vpack.c.bf16 %v2082_v45, %v2081_v9  ;;  %v3532_v9 = vpack.c.bf16 %v1940_v4, %v1939_v3  ;;  %v3534_v45 = vpack.c.bf16 %v1958_v8, %v1957_v7  ;;  %v1988_v61 = vld [vmem:[%s6014_s7 + $0x2b8] sm:$0xff]  ;;  %v1989_v3 = vld [vmem:[%s6014_s7 + $0x2c0] sm:$0xff]  ;;  %v1990_v4 = vld [vmem:[%s6014_s7 + $0x2c8] sm:$0xff] }
 0x4b2   :  { %3107 = vmatmul.mubr.msk.f32.vlgmr.msra.gmra.mrb[26].mxu0 %vm1368_vm1, %v5172_v55  ;;  %v1924_v55 = vld [vmem:[%s6014_s7 + $0xb8] sm:$0xff]  ;;  %v3562_v0 = vpack.c.bf16 %v1988_v61, %v1987_v60  ;;  %v3566_v7 = vpack.c.bf16 %v1990_v4, %v1989_v3  ;;  %v1973_v8 = vld [vmem:[%s6014_s7 + $0x240] sm:$0xff]  ;;  %v2006_v61 = vld [vmem:[%s6014_s7 + $0x348] sm:$0xff] }
 0x4b3   :  { %3489 = vmatpush3.bf16.msra.mxu0 %v3488_v32  ;;  %v3498_v22 = vpack.c.bf16 %v1924_v55, %v1923_v16  ;;  %3655 = vmatprep.subr.bf16.mxu1 %v3654_v46  ;;  %v2083_v32 = vld [vmem:[%s6014_s7 + $0x5b0] sm:$0xff]  ;;  %v2070_v16 = vld [vmem:[%s6014_s7 + $0x548] sm:$0xff]  ;;  %v2005_v60 = vld [vmem:[%s6014_s7 + $0x340] sm:$0xff] }
 0x4b4   :  { %3491 = vmatprep.subr.bf16.mxu0 %v3490_v19  ;;  %v2084_v19 = vld [vmem:[%s6014_s7 + $0x5b8] sm:$0xff]  ;;  %v3664_v55 = vpack.c.bf16 %v2070_v16, %v2069_v26  ;;  %v1942_v46 = vld [vmem:[%s6014_s7 + $0x148] sm:$0xff]  ;;  %v2007_v3 = vld [vmem:[%s6014_s7 + $0x350] sm:$0xff] }
 0x4b5   :  { %3657 = vmatpush3.bf16.msra.mxu1 %v3656_v11  ;;  %v3658_v23 = vpack.c.bf16 %v2084_v19, %v2083_v32  ;;  %v1959_v11 = vld [vmem:[%s6014_s7 + $0x1d0] sm:$0xff]  ;;  %v1960_v32 = vld [vmem:[%s6014_s7 + $0x1d8] sm:$0xff]  ;;  %v3536_v17 = vpack.c.bf16 %v1942_v46, %v1941_v35  ;;  %v1962_v26 = vld [vmem:[%s6014_s7 + $0x1e8] sm:$0xff] }
 0x4b6   :  { %v2008_v4 = vld [vmem:[%s6014_s7 + $0x358] sm:$0xff] }
 0x4b7   :  { %3493 = vmatpush3.bf16.msra.mxu0 %v3492_v25  ;;  %3659 = vmatprep.subr.bf16.mxu1 %v3658_v23  ;;  %v2085_v25 = vld [vmem:[%s6014_s7 + $0x5c0] sm:$0xff]  ;;  %v3538_v23 = vpack.c.bf16 %v1960_v32, %v1959_v11  ;;  %v1975_v11 = vld [vmem:[%s6014_s7 + $0x250] sm:$0xff]  ;;  %v1976_v32 = vld [vmem:[%s6014_s7 + $0x258] sm:$0xff] }
 0x4b8   :  { %3495 = vmatprep.subr.bf16.mxu0 %v3494_v62  ;;  %v2086_v62 = vld [vmem:[%s6014_s7 + $0x5c8] sm:$0xff] }
 0x4b9   :  { %3661 = vmatpush3.bf16.msra.mxu1 %v3660_v28  ;;  %v3662_v30 = vpack.c.bf16 %v2086_v62, %v2085_v25  ;;  %v1944_v28 = vld [vmem:[%s6014_s7 + $0x158] sm:$0xff]  ;;  %v1961_v62 = vld [vmem:[%s6014_s7 + $0x1e0] sm:$0xff] }
 0x4ba   :  { %v3540_v16 = vpack.c.bf16 %v1944_v28, %v1943_v29  ;;  %v1977_v28 = vld [vmem:[%s6014_s7 + $0x260] sm:$0xff] }
 0x4bb   :  { %3497 = vmatpush3.bf16.msra.mxu0 %v3496_v33  ;;  %3663 = vmatprep.subr.bf16.mxu1 %v3662_v30  ;;  %v2087_v33 = vld [vmem:[%s6014_s7 + $0x5d0] sm:$0xff] }
 0x4bc   :  { %3499 = vmatprep.subr.bf16.mxu0 %v3498_v22  ;;  %v2088_v22 = vld [vmem:[%s6014_s7 + $0x5d8] sm:$0xff] }
 0x4bd   :  { %3665 = vmatpush3.bf16.msra.mxu1 %v3664_v55  ;;  %v3666_v27 = vpack.c.bf16 %v2088_v22, %v2087_v33  ;;  %v3542_v55 = vpack.c.bf16 %v1962_v26, %v1961_v62  ;;  %v1945_v33 = vld [vmem:[%s6014_s7 + $0x160] sm:$0xff]  ;;  %v1946_v22 = vld [vmem:[%s6014_s7 + $0x168] sm:$0xff]  ;;  %v1995_v26 = vld [vmem:[%s6014_s7 + $0x2f0] sm:$0xff] }
 0x4be   :  { %v1978_v62 = vld [vmem:[%s6014_s7 + $0x268] sm:$0xff] }
 0x4bf   :  { %3501 = vmatpush3.bf16.msra.mxu0 %v3500_v38  ;;  %3667 = vmatprep.subr.bf16.mxu1 %v3666_v27  ;;  %v2089_v38 = vld [vmem:[%s6014_s7 + $0x5e0] sm:$0xff]  ;;  %v1963_v27 = vld [vmem:[%s6014_s7 + $0x1f0] sm:$0xff] }
 0x4c0   :  { %3503 = vmatprep.subr.bf16.mxu0 %v3502_v39  ;;  %v2090_v39 = vld [vmem:[%s6014_s7 + $0x5e8] sm:$0xff] }
 0x4c1   :  { %3669 = vmatpush3.bf16.msra.mxu1 %v3668_v20  ;;  %v3670_v41 = vpack.c.bf16 %v2090_v39, %v2089_v38  ;;  %v3544_v38 = vpack.c.bf16 %v1946_v22, %v1945_v33  ;;  %v3546_v39 = vpack.c.bf16 %v1964_v31, %v1963_v27  ;;  %v1979_v22 = vld [vmem:[%s6014_s7 + $0x270] sm:$0xff]  ;;  %v1980_v27 = vld [vmem:[%s6014_s7 + $0x278] sm:$0xff]  ;;  %v2013_v31 = vld [vmem:[%s6014_s7 + $0x380] sm:$0xff] }
 0x4c3   :  { %3505 = vmatpush3.bf16.msra.mxu0 %v3504_v42  ;;  %v2074_v42 = vld [vmem:[%s6014_s7 + $0x568] sm:$0xff]  ;;  %3671 = vmatprep.subr.bf16.mxu1 %v3670_v41  ;;  %v1981_v41 = vld [vmem:[%s6014_s7 + $0x280] sm:$0xff] }
 0x4c4   :  { %3507 = vmatprep.subr.bf16.mxu0 %v3506_v14  ;;  %v1951_v14 = vld [vmem:[%s6014_s7 + $0x190] sm:$0xff]  ;;  %v3672_v37 = vpack.c.bf16 %v2074_v42, %v2073_v51  ;;  %v1982_v42 = vld [vmem:[%s6014_s7 + $0x288] sm:$0xff] }
 0x4c5   :  { %v3522_v50 = vpack.c.bf16 %v1952_v34, %v1951_v14  ;;  %v1947_v51 = vld [vmem:[%s6014_s7 + $0x170] sm:$0xff] }
 0x4c6   :  { %3673 = vmatpush3.bf16.msra.mxu1 %v3672_v37  ;;  %v3548_v34 = vpack.c.bf16 %v1948_v18, %v1947_v51  ;;  %v3550_v37 = vpack.c.bf16 %v1982_v42, %v1981_v41  ;;  %v1997_v18 = vld [vmem:[%s6014_s7 + $0x300] sm:$0xff]  ;;  %v2015_v41 = vld [vmem:[%s6014_s7 + $0x390] sm:$0xff]  ;;  %v2016_v42 = vld [vmem:[%s6014_s7 + $0x398] sm:$0xff] }
 0x4c7   :  { %3509 = vmatpush3.bf16.msra.mxu0 %v3508_v47  ;;  %v2091_v47 = vld [vmem:[%s6014_s7 + $0x5f0] sm:$0xff] }
 0x4c8   :  { %3511 = vmatprep.subr.bf16.mxu0 %v3510_v48  ;;  %v2092_v48 = vld [vmem:[%s6014_s7 + $0x5f8] sm:$0xff] }
 0x4cb   :  { %3513 = vmatpush3.bf16.msra.mxu0 %v3512_v13  ;;  %v1936_v13 = vld [vmem:[%s6014_s7 + $0x118] sm:$0xff] }
 0x4cc   :  { %3515 = vmatprep.subr.bf16.mxu0 %v3514_v53  ;;  %v3674_v53 = vpack.c.bf16 %v2092_v48, %v2091_v47  ;;  %v3524_v58 = vpack.c.bf16 %v1936_v13, %v1935_v52  ;;  %v1983_v48 = vld [vmem:[%s6014_s7 + $0x290] sm:$0xff] }
 0x4cd   :  { %v3554_v52 = vpack.c.bf16 %v1984_v5, %v1983_v48  ;;  %v1967_v13 = vld [vmem:[%s6014_s7 + $0x210] sm:$0xff]  ;;  %v2018_v48 = vld [vmem:[%s6014_s7 + $0x3a8] sm:$0xff] }
 0x4ce   :  { %3675 = vmatprep.subr.bf16.mxu1 %v3674_v53  ;;  %v1968_v53 = vld [vmem:[%s6014_s7 + $0x218] sm:$0xff] }
 0x4cf   :  { %3517 = vmatpush3.bf16.msra.mxu0 %v3516_v54  ;;  %v1954_v54 = vld [vmem:[%s6014_s7 + $0x1a8] sm:$0xff]  ;;  %3677 = vmatpush3.bf16.msra.mxu1 %v3676_v57 }
 0x4d0   :  { %3519 = vmatprep.subr.bf16.mxu0 %v3518_v59  ;;  %v3526_v59 = vpack.c.bf16 %v1954_v54, %v1953_v15  ;;  %3690 = vmatprep.subr.bf16.mxu1 %v3967_v21  ;;  %v1986_v15 = vld [vmem:[%s6014_s7 + $0x2a8] sm:$0xff]  ;;  %v3556_v54 = vpack.c.bf16 %v1968_v53, %v1967_v13  ;;  %v2019_v13 = vld [vmem:[%s6014_s7 + $0x3b0] sm:$0xff] }
 0x4d1   :  { %v3558_v57 = vpack.c.bf16 %v1986_v15, %v1985_v12  ;;  %v2003_v12 = vld [vmem:[%s6014_s7 + $0x330] sm:$0xff]  ;;  %v2004_v15 = vld [vmem:[%s6014_s7 + $0x338] sm:$0xff] }
 0x568   :  { %v1471_v43 = vpop.f32.mrb[14].mxu0 }
 0x569   :  { %v1473_v49 = vpop.f32.mrb[15].mxu0 }
 0x56a   :  { %2175 = vmatprep.mubr.f32.mxu0 %v1473_v49 }
 0x56b   :  { %2176 = vmatmul.mubr.f32.vlgmr.msra.gmra.mrb[28].mxu0 %v1471_v43  ;;  %v1965_v43 = vld [vmem:[%s6014_s7 + $0x200] sm:$0xff] }
 0x56c   :  { %3521 = vmatpush3.bf16.msra.mxu0 %v3520_v44  ;;  %v1966_v44 = vld [vmem:[%s6014_s7 + $0x208] sm:$0xff] }
 0x56d   :  { %3523 = vmatprep.subr.bf16.mxu0 %v3522_v50  ;;  %v3552_v50 = vpack.c.bf16 %v1966_v44, %v1965_v43  ;;  %v2000_v43 = vld [vmem:[%s6014_s7 + $0x318] sm:$0xff]  ;;  %v2017_v44 = vld [vmem:[%s6014_s7 + $0x3a0] sm:$0xff] }
 0x570   :  { %3525 = vmatpush3.bf16.msra.mxu0 %v3524_v58  ;;  %v1969_v58 = vld [vmem:[%s6014_s7 + $0x220] sm:$0xff] }
 0x571   :  { %3527 = vmatprep.subr.bf16.mxu0 %v3526_v59  ;;  %v5498_v6 = vpop.f32.mrb[16].mxu0  ;;  %v1970_v59 = vld [vmem:[%s6014_s7 + $0x228] sm:$0xff] }
 0x572   :  { %v1544_v24 = vpop.f32.mrb[17].mxu0  ;;  %v3560_v63 = vpack.c.bf16 %v1970_v59, %v1969_v58  ;;  %v3596_v58 = vpack.c.bf16 %v2004_v15, %v2003_v12  ;;  %v2039_v12 = vld [vmem:[%s6014_s7 + $0x450] sm:$0xff]  ;;  %v2040_v15 = vld [vmem:[%s6014_s7 + $0x458] sm:$0xff] }
 0x573   :  { %2245 = vmatprep.mubr.f32.mxu0 %v1544_v24  ;;  %v1974_v24 = vld [vmem:[%s6014_s7 + $0x248] sm:$0xff] }
 0x574   :  { %3529 = vmatpush3.bf16.msra.mxu0 %v3528_v1  ;;  %v1971_v1 = vld [vmem:[%s6014_s7 + $0x230] sm:$0xff]  ;;  %v3568_v35 = vpack.c.bf16 %v1974_v24, %v1973_v8  ;;  %v3604_v8 = vpack.c.bf16 %v2008_v4, %v2007_v3  ;;  %v2044_v4 = vld [vmem:[%s6014_s7 + $0x478] sm:$0xff] }
 0x575   :  { %3531 = vmatprep.subr.bf16.mxu0 %v3530_v2  ;;  %v5512_v36 = vpop.f32.mrb[18].mxu0  ;;  %v1972_v2 = vld [vmem:[%s6014_s7 + $0x238] sm:$0xff]  ;;  %v2043_v3 = vld [vmem:[%s6014_s7 + $0x470] sm:$0xff] }
 0x576   :  { %v1615_v19 = vpop.f32.mrb[19].mxu0 }
 0x578   :  { %3533 = vmatpush3.bf16.msra.mxu0 %v3532_v9  ;;  %v1991_v9 = vld [vmem:[%s6014_s7 + $0x2d0] sm:$0xff] }
 0x579   :  { %3535 = vmatprep.subr.bf16.mxu0 %v3534_v45  ;;  %v5526_v25 = vpop.f32.mrb[20].mxu0  ;;  %v1992_v45 = vld [vmem:[%s6014_s7 + $0x2d8] sm:$0xff] }
 0x57a   :  { %v5534_v30 = vpop.f32.mrb[21].mxu0  ;;  %v3570_v46 = vpack.c.bf16 %v1992_v45, %v1991_v9  ;;  %v2009_v9 = vld [vmem:[%s6014_s7 + $0x360] sm:$0xff]  ;;  %v2010_v45 = vld [vmem:[%s6014_s7 + $0x368] sm:$0xff] }
 0x57c   :  { %3537 = vmatpush3.bf16.msra.mxu0 %v3536_v17  ;;  %v1994_v17 = vld [vmem:[%s6014_s7 + $0x2e8] sm:$0xff] }
 0x57d   :  { %3539 = vmatprep.subr.bf16.mxu0 %v3538_v23  ;;  %v5542_v56 = vpop.f32.mrb[22].mxu0  ;;  %v3572_v23 = vpack.c.bf16 %v1976_v32, %v1975_v11  ;;  %v3608_v11 = vpack.c.bf16 %v2010_v45, %v2009_v9  ;;  %v2095_v9 = vld [vmem:[%s6014_s7 + $0x610] sm:$0xff]  ;;  %v2096_v45 = vld [vmem:[%s6014_s7 + $0x618] sm:$0xff] }
 0x57e   :  { %v5550_v20 = vpop.f32.mrb[23].mxu0 }
 0x580   :  { %3541 = vmatpush3.bf16.msra.mxu0 %v3540_v16  ;;  %v1996_v16 = vld [vmem:[%s6014_s7 + $0x2f8] sm:$0xff] }
 0x581   :  { %3543 = vmatprep.subr.bf16.mxu0 %v3542_v55  ;;  %v1826_v40 = vpop.f32.mrb[24].mxu0  ;;  %v3576_v55 = vpack.c.bf16 %v1978_v62, %v1977_v28  ;;  %v3578_v33 = vpack.c.bf16 %v1996_v16, %v1995_v26  ;;  %v2029_v26 = vld [vmem:[%s6014_s7 + $0x400] sm:$0xff]  ;;  %v2030_v16 = vld [vmem:[%s6014_s7 + $0x408] sm:$0xff] }
 0x582   :  { %v1828_v14 = vpop.f32.mrb[25].mxu0 }
 0x583   :  { %2525 = vmatprep.mubr.f32.mxu1 %v1828_v14 }
 0x584   :  { %3545 = vmatpush3.bf16.msra.mxu0 %v3544_v38  ;;  %2526 = vmatmul.mubr.f32.vlgmr.msra.gmra.mrb[14].mxu1 %v1826_v40  ;;  %v2014_v38 = vld [vmem:[%s6014_s7 + $0x388] sm:$0xff] }
 0x585   :  { %3547 = vmatprep.subr.bf16.mxu0 %v3546_v39  ;;  %v5570_v47 = vpop.f32.mrb[26].mxu0  ;;  %3158 = vmatprep.mubr.msk.f32.mxu1 %vm3968_vm0, %v3959_v10  ;;  %v3580_v39 = vpack.c.bf16 %v1980_v27, %v1979_v22  ;;  %v3582_v51 = vpack.c.bf16 %v2014_v38, %v2013_v31  ;;  %v1998_v40 = vld [vmem:[%s6014_s7 + $0x308] sm:$0xff]  ;;  %v3616_v22 = vpack.c.bf16 %v2030_v16, %v2029_v26  ;;  %v2031_v31 = vld [vmem:[%s6014_s7 + $0x410] sm:$0xff]  ;;  %v2032_v38 = vld [vmem:[%s6014_s7 + $0x418] sm:$0xff] }
 0x586   :  { %v3108_v49 = vpop.f32.mrb[27].mxu0  ;;  %v3584_v14 = vpack.c.bf16 %v1998_v40, %v1997_v18  ;;  %v3620_v18 = vpack.c.bf16 %v2032_v38, %v2031_v31 }
 0x587   :  { %v3590_v49 = vpack.c.bf16 %v2018_v48, %v2017_v44  ;;  %v2053_v44 = vld [vmem:[%s6014_s7 + $0x4c0] sm:$0xff]  ;;  %v2054_v48 = vld [vmem:[%s6014_s7 + $0x4c8] sm:$0xff] }
 0x588   :  { %3549 = vmatpush3.bf16.msra.mxu0 %v3548_v34  ;;  %v3586_v34 = vpack.c.bf16 %v2016_v42, %v2015_v41  ;;  %v2033_v41 = vld [vmem:[%s6014_s7 + $0x420] sm:$0xff]  ;;  %v2034_v42 = vld [vmem:[%s6014_s7 + $0x428] sm:$0xff] }
 0x589   :  { %3551 = vmatprep.subr.bf16.mxu0 %v3550_v37  ;;  %v1999_v37 = vld [vmem:[%s6014_s7 + $0x310] sm:$0xff] }
 0x58a   :  { %v3588_v5 = vpack.c.bf16 %v2000_v43, %v1999_v37  ;;  %v2035_v37 = vld [vmem:[%s6014_s7 + $0x430] sm:$0xff]  ;;  %v2036_v43 = vld [vmem:[%s6014_s7 + $0x438] sm:$0xff] }
 0x58b   :  { %2246 = vmatmul.mubr.f32.vlgmr.msra.gmra.mrb[30].mxu0 %v5498_v6  ;;  %v3564_v6 = vpack.c.bf16 %v1972_v2, %v1971_v1  ;;  %v3600_v1 = vpack.c.bf16 %v2006_v61, %v2005_v60  ;;  %v2041_v60 = vld [vmem:[%s6014_s7 + $0x460] sm:$0xff]  ;;  %v2042_v61 = vld [vmem:[%s6014_s7 + $0x468] sm:$0xff] }
 0x58c   :  { %3553 = vmatpush3.bf16.msra.mxu0 %v3552_v50  ;;  %2315 = vmatprep.mubr.f32.mxu0 %v1615_v19  ;;  %v1993_v19 = vld [vmem:[%s6014_s7 + $0x2e0] sm:$0xff] }
 0x58d   :  { %3555 = vmatprep.subr.bf16.mxu0 %v3554_v52  ;;  %v3574_v29 = vpack.c.bf16 %v1994_v17, %v1993_v19  ;;  %v2001_v50 = vld [vmem:[%s6014_s7 + $0x320] sm:$0xff]  ;;  %v2002_v52 = vld [vmem:[%s6014_s7 + $0x328] sm:$0xff]  ;;  %v2011_v19 = vld [vmem:[%s6014_s7 + $0x370] sm:$0xff] }
 0x58e   :  { %v2012_v17 = vld [vmem:[%s6014_s7 + $0x378] sm:$0xff] }
 0x58f   :  { %v3612_v28 = vpack.c.bf16 %v2012_v17, %v2011_v19  ;;  %v2100_v19 = vld [vmem:[%s6014_s7 + $0x638] sm:$0xff] }
 0x590   :  { %3557 = vmatpush3.bf16.msra.mxu0 %v3556_v54  ;;  %v2021_v54 = vld [vmem:[%s6014_s7 + $0x3c0] sm:$0xff] }
 0x591   :  { %3559 = vmatprep.subr.bf16.mxu0 %v3558_v57  ;;  %v2022_v57 = vld [vmem:[%s6014_s7 + $0x3c8] sm:$0xff] }
 0x592   :  { %v3598_v59 = vpack.c.bf16 %v2022_v57, %v2021_v54  ;;  %v2057_v54 = vld [vmem:[%s6014_s7 + $0x4e0] sm:$0xff]  ;;  %v2058_v57 = vld [vmem:[%s6014_s7 + $0x4e8] sm:$0xff] }
 0x594   :  { %3561 = vmatpush3.bf16.msra.mxu0 %v3560_v63  ;;  %v2023_v63 = vld [vmem:[%s6014_s7 + $0x3d0] sm:$0xff] }
 0x595   :  { %3563 = vmatprep.subr.bf16.mxu0 %v3562_v0  ;;  %v2024_v0 = vld [vmem:[%s6014_s7 + $0x3d8] sm:$0xff] }
 0x596   :  { %v3602_v2 = vpack.c.bf16 %v2024_v0, %v2023_v63  ;;  %v2059_v63 = vld [vmem:[%s6014_s7 + $0x4f0] sm:$0xff]  ;;  %v2060_v0 = vld [vmem:[%s6014_s7 + $0x4f8] sm:$0xff] }
 0x598   :  { %3565 = vmatpush3.bf16.msra.mxu0 %v3564_v6  ;;  %v2025_v6 = vld [vmem:[%s6014_s7 + $0x3e0] sm:$0xff] }
 0x599   :  { %3567 = vmatprep.subr.bf16.mxu0 %v3566_v7  ;;  %v2026_v7 = vld [vmem:[%s6014_s7 + $0x3e8] sm:$0xff] }
 0x59a   :  { %v3606_v24 = vpack.c.bf16 %v2026_v7, %v2025_v6  ;;  %v3644_v6 = vpack.c.bf16 %v2044_v4, %v2043_v3  ;;  %v2093_v7 = vld [vmem:[%s6014_s7 + $0x600] sm:$0xff]  ;;  %v2710_v3 = vld [vmem:[%s6018_s11 + $0x48] sm:$0xff] }
 0x59c   :  { %3569 = vmatpush3.bf16.msra.mxu0 %v3568_v35  ;;  %v2027_v35 = vld [vmem:[%s6014_s7 + $0x3f0] sm:$0xff] }
 0x59d   :  { %3571 = vmatprep.subr.bf16.mxu0 %v3570_v46  ;;  %v2028_v46 = vld [vmem:[%s6014_s7 + $0x3f8] sm:$0xff] }
 0x59e   :  { %v3610_v32 = vpack.c.bf16 %v2028_v46, %v2027_v35  ;;  %v3682_v35 = vpack.c.bf16 %v2096_v45, %v2095_v9  ;;  %v2097_v46 = vld [vmem:[%s6014_s7 + $0x620] sm:$0xff] }
 0x5a0   :  { %3573 = vmatpush3.bf16.msra.mxu0 %v3572_v23  ;;  %v2045_v23 = vld [vmem:[%s6014_s7 + $0x480] sm:$0xff] }
 0x5a1   :  { %3575 = vmatprep.subr.bf16.mxu0 %v3574_v29  ;;  %v2046_v29 = vld [vmem:[%s6014_s7 + $0x488] sm:$0xff] }
 0x5a2   :  { %v3614_v62 = vpack.c.bf16 %v2046_v29, %v2045_v23 }
 0x5a4   :  { %3577 = vmatpush3.bf16.msra.mxu0 %v3576_v55  ;;  %v2047_v55 = vld [vmem:[%s6014_s7 + $0x490] sm:$0xff] }
 0x5a5   :  { %3579 = vmatprep.subr.bf16.mxu0 %v3578_v33  ;;  %v2048_v33 = vld [vmem:[%s6014_s7 + $0x498] sm:$0xff] }
 0x5a6   :  { %v3618_v27 = vpack.c.bf16 %v2048_v33, %v2047_v55  ;;  %v2606_v55 = vld [vmem:[%s6016_s9] sm:$0xff]  ;;  %v2607_v33 = vld [vmem:[%s6016_s9 + $0x8] sm:$0xff] }
 0x5a8   :  { %3581 = vmatpush3.bf16.msra.mxu0 %v3580_v39  ;;  %v2049_v39 = vld [vmem:[%s6014_s7 + $0x4a0] sm:$0xff] }
 0x5a9   :  { %3583 = vmatprep.subr.bf16.mxu0 %v3582_v51  ;;  %v2050_v51 = vld [vmem:[%s6014_s7 + $0x4a8] sm:$0xff] }
 0x5aa   :  { %v3622_v40 = vpack.c.bf16 %v2050_v51, %v2049_v39  ;;  %v2608_v51 = vld [vmem:[%s6016_s9 + $0x10] sm:$0xff] }
 0x5ab   :  { %2316 = vmatmul.mubr.f32.vlgmr.msra.gmra.mrb[32].mxu0 %v5512_v36  ;;  %v2020_v36 = vld [vmem:[%s6014_s7 + $0x3b8] sm:$0xff] }
 0x5ac   :  { %3585 = vmatpush3.bf16.msra.mxu0 %v3584_v14  ;;  %2385 = vmatprep.mubr.f32.mxu0 %v5534_v30  ;;  %v3592_v30 = vpack.c.bf16 %v2002_v52, %v2001_v50  ;;  %v3594_v53 = vpack.c.bf16 %v2020_v36, %v2019_v13  ;;  %v2051_v14 = vld [vmem:[%s6014_s7 + $0x4b0] sm:$0xff]  ;;  %v2037_v50 = vld [vmem:[%s6014_s7 + $0x440] sm:$0xff]  ;;  %v2038_v52 = vld [vmem:[%s6014_s7 + $0x448] sm:$0xff] }
 0x5ad   :  { %3587 = vmatprep.subr.bf16.mxu0 %v3586_v34  ;;  %v2055_v13 = vld [vmem:[%s6014_s7 + $0x4d0] sm:$0xff]  ;;  %v2056_v36 = vld [vmem:[%s6014_s7 + $0x4d8] sm:$0xff] }
 0x5b0   :  { %3589 = vmatpush3.bf16.msra.mxu0 %v3588_v5  ;;  %v3628_v5 = vpack.c.bf16 %v2036_v43, %v2035_v37  ;;  %v2614_v43 = vld [vmem:[%s6016_s9 + $0x40] sm:$0xff] }
 0x5b1   :  { %3591 = vmatprep.subr.bf16.mxu0 %v3590_v49  ;;  %v3630_v49 = vpack.c.bf16 %v2054_v48, %v2053_v44  ;;  %v2615_v44 = vld [vmem:[%s6016_s9 + $0x48] sm:$0xff] }
 0x5b2   :  { %v3703_v48 = vpack.c.bf16 %v2615_v44, %v2614_v43 }
 0x5b4   :  { %3593 = vmatpush3.bf16.msra.mxu0 %v3592_v30  ;;  %v3632_v30 = vpack.c.bf16 %v2038_v52, %v2037_v50  ;;  %v2701_v50 = vld [vmem:[%s6018_s11] sm:$0xff]  ;;  %v2702_v52 = vld [vmem:[%s6018_s11 + $0x8] sm:$0xff] }
 0x5b5   :  { %3595 = vmatprep.subr.bf16.mxu0 %v3594_v53  ;;  %v3634_v53 = vpack.c.bf16 %v2056_v36, %v2055_v13  ;;  %v2703_v13 = vld [vmem:[%s6018_s11 + $0x10] sm:$0xff]  ;;  %v3712_v36 = vpack.c.bf16 %v2702_v52, %v2701_v50 }
 0x5b8   :  { %3597 = vmatpush3.bf16.msra.mxu0 %v3596_v58  ;;  %v3636_v58 = vpack.c.bf16 %v2040_v15, %v2039_v12  ;;  %v2618_v12 = vld [vmem:[%s6016_s9 + $0x60] sm:$0xff]  ;;  %v2619_v15 = vld [vmem:[%s6016_s9 + $0x68] sm:$0xff] }
 0x5b9   :  { %3599 = vmatprep.subr.bf16.mxu0 %v3598_v59  ;;  %v3638_v59 = vpack.c.bf16 %v2058_v57, %v2057_v54  ;;  %v2705_v57 = vld [vmem:[%s6018_s11 + $0x20] sm:$0xff] }
 0x5bc   :  { %3601 = vmatpush3.bf16.msra.mxu0 %v3600_v1  ;;  %v3640_v1 = vpack.c.bf16 %v2042_v61, %v2041_v60  ;;  %v2707_v61 = vld [vmem:[%s6018_s11 + $0x30] sm:$0xff] }
 0x5bd   :  { %3603 = vmatprep.subr.bf16.mxu0 %v3602_v2  ;;  %v3642_v2 = vpack.c.bf16 %v2060_v0, %v2059_v63  ;;  %v2708_v63 = vld [vmem:[%s6018_s11 + $0x38] sm:$0xff]  ;;  %v2620_v0 = vld [vmem:[%s6016_s9 + $0x70] sm:$0xff] }
 0x5c0   :  { %3605 = vmatpush3.bf16.msra.mxu0 %v3604_v8  ;;  %v2094_v8 = vld [vmem:[%s6014_s7 + $0x608] sm:$0xff] }
 0x5c1   :  { %3607 = vmatprep.subr.bf16.mxu0 %v3606_v24  ;;  %v3679_v24 = vpack.c.bf16 %v2094_v8, %v2093_v7 }
 0x5c4   :  { %3609 = vmatpush3.bf16.msra.mxu0 %v3608_v11  ;;  %v2098_v11 = vld [vmem:[%s6014_s7 + $0x628] sm:$0xff] }
 0x5c5   :  { %3611 = vmatprep.subr.bf16.mxu0 %v3610_v32  ;;  %v3685_v32 = vpack.c.bf16 %v2098_v11, %v2097_v46 }
 0x5c8   :  { %3613 = vmatpush3.bf16.msra.mxu0 %v3612_v28 }
 0x5c9   :  { %3615 = vmatprep.subr.bf16.mxu0 %v3614_v62 }
 0x5cb   :  { %2386 = vmatmul.mubr.f32.vlgmr.msra.gmra.mrb[34].mxu0 %v5526_v25  ;;  %v2052_v25 = vld [vmem:[%s6014_s7 + $0x4b8] sm:$0xff] }
 0x5cc   :  { %3617 = vmatpush3.bf16.msra.mxu0 %v3616_v22  ;;  %2455 = vmatprep.mubr.f32.mxu0 %v5550_v20  ;;  %v3624_v20 = vpack.c.bf16 %v2034_v42, %v2033_v41  ;;  %v3626_v34 = vpack.c.bf16 %v2052_v25, %v2051_v14  ;;  %v3691_v22 = vpack.c.bf16 %v2607_v33, %v2606_v55  ;;  %v2610_v42 = vld [vmem:[%s6016_s9 + $0x20] sm:$0xff]  ;;  %v2611_v14 = vld [vmem:[%s6016_s9 + $0x28] sm:$0xff]  ;;  %v2711_v33 = vld [vmem:[%s6018_s11 + $0x50] sm:$0xf] }
 0x5cd   :  { %3619 = vmatprep.subr.bf16.mxu0 %v3618_v27  ;;  %v3697_v25 = vpack.c.bf16 %v2611_v14, %v2610_v42 }
 0x5ce   :  { %3692 = vmatpush3.bf16.msra.mxu1 %v3691_v22 }
 0x5cf   :  { %3693 = vmatprep.subr.bf16.mxu1 %v3967_v21 }
 0x5d0   :  { %3621 = vmatpush3.bf16.msra.mxu0 %v3620_v18  ;;  %v2609_v18 = vld [vmem:[%s6016_s9 + $0x18] sm:$0xff] }
 0x5d1   :  { %3623 = vmatprep.subr.bf16.mxu0 %v3622_v40  ;;  %v3694_v40 = vpack.c.bf16 %v2609_v18, %v2608_v51 }
 0x5d3   :  { %3695 = vmatpush3.bf16.msra.mxu1 %v3694_v40 }
 0x5d4   :  { %3625 = vmatpush3.bf16.msra.mxu0 %v3624_v20  ;;  %3696 = vmatprep.subr.bf16.mxu1 %v3967_v21  ;;  %v2612_v20 = vld [vmem:[%s6016_s9 + $0x30] sm:$0xff] }
 0x5d5   :  { %3627 = vmatprep.subr.bf16.mxu0 %v3626_v34  ;;  %v2613_v34 = vld [vmem:[%s6016_s9 + $0x38] sm:$0xff] }
 0x5d6   :  { %v3700_v37 = vpack.c.bf16 %v2613_v34, %v2612_v20 }
 0x5d7   :  { %3698 = vmatpush3.bf16.msra.mxu1 %v3697_v25 }
 0x5d8   :  { %3629 = vmatpush3.bf16.msra.mxu0 %v3628_v5  ;;  %3699 = vmatprep.subr.bf16.mxu1 %v3967_v21  ;;  %v2616_v5 = vld [vmem:[%s6016_s9 + $0x50] sm:$0xff] }
 0x5d9   :  { %3631 = vmatprep.subr.bf16.mxu0 %v3630_v49  ;;  %v2617_v49 = vld [vmem:[%s6016_s9 + $0x58] sm:$0xff] }
 0x5db   :  { %3701 = vmatpush3.bf16.msra.mxu1 %v3700_v37 }
 0x5dc   :  { %3633 = vmatpush3.bf16.msra.mxu0 %v3632_v30  ;;  %3702 = vmatprep.subr.bf16.mxu1 %v3967_v21  ;;  %v2704_v30 = vld [vmem:[%s6018_s11 + $0x18] sm:$0xff] }
 0x5dd   :  { %3635 = vmatprep.subr.bf16.mxu0 %v3634_v53  ;;  %v3706_v53 = vpack.c.bf16 %v2617_v49, %v2616_v5  ;;  %v3715_v54 = vpack.c.bf16 %v2704_v30, %v2703_v13 }
 0x5df   :  { %3704 = vmatpush3.bf16.msra.mxu1 %v3703_v48 }
 0x5e0   :  { %3637 = vmatpush3.bf16.msra.mxu0 %v3636_v58  ;;  %3705 = vmatprep.subr.bf16.mxu1 %v3967_v21  ;;  %v2706_v58 = vld [vmem:[%s6018_s11 + $0x28] sm:$0xff] }
 0x5e1   :  { %3639 = vmatprep.subr.bf16.mxu0 %v3638_v59  ;;  %v3709_v59 = vpack.c.bf16 %v2619_v15, %v2618_v12  ;;  %v3718_v60 = vpack.c.bf16 %v2706_v58, %v2705_v57 }
 0x5e3   :  { %3707 = vmatpush3.bf16.msra.mxu1 %v3706_v53 }
 0x5e4   :  { %3641 = vmatpush3.bf16.msra.mxu0 %v3640_v1  ;;  %3708 = vmatprep.subr.bf16.mxu1 %v3967_v21  ;;  %v3721_v1 = vpack.c.bf16 %v2708_v63, %v2707_v61 }
 0x5e5   :  { %3643 = vmatprep.subr.bf16.mxu0 %v3642_v2  ;;  %v2709_v2 = vld [vmem:[%s6018_s11 + $0x40] sm:$0xff]  ;;  %s3935_s11 = scalar_lea.vmem %s2804_s18, 32 }
 0x5e6   :  { %v3724_v4 = vpack.c.bf16 %v2710_v3, %v2709_v2  ;;  %p3936_p0 = scmp.ne.s32.totalorder %s2804_s18, %s3935_s11  ;;  %p3941_p2 = scmp.lt.s32.totalorder %s3935_s11, %s3935_s11 }
 0x5e7   :  { %3710 = vmatpush3.bf16.msra.mxu1 %v3709_v59 }
 0x5e8   :  { %3645 = vmatpush3.bf16.msra.mxu0 %v3644_v6  ;;  %3156 = vmatprep.subr.mxu1 %v3959_v10  ;;  %p3942_p3 = por %p3941_p2, %p3940_p1 }
 0x5e9   :  { %3678 = vmatprep.subr.bf16.mxu0 %v3967_v21 }
 0x5ea   :  { %p3943_p4 = pnand %p3942_p3, %p3936_p0 }
 0x5eb   :  { %2456 = vmatmul.mubr.f32.vlgmr.msra.gmra.mrb[36].mxu0 %v5542_v56  ;;  %v2099_v56 = vld [vmem:[%s6014_s7 + $0x630] sm:$0xff]  ;;  %3157 = vmatpush3.msra.mxu1 %v2620_v0 }
 0x5ec   :  { %3680 = vmatpush3.bf16.msra.mxu0 %v3679_v24  ;;  %3125 = vmatprep.mubr.msk.f32.mxu0 %vm3968_vm0, %v3959_v10  ;;  %v3688_v17 = vpack.c.bf16 %v2100_v19, %v2099_v56 }
 0x5ed   :  { %3681 = vmatprep.subr.bf16.mxu0 %v3967_v21 }
 0x5f0   :  { %3683 = vmatpush3.bf16.msra.mxu0 %v3682_v35 }
 0x5f1   :  { %3684 = vmatprep.subr.bf16.mxu0 %v3967_v21 }
 0x5f4   :  { %3686 = vmatpush3.bf16.msra.mxu0 %v3685_v32 }
 0x5f5   :  { %3687 = vmatprep.subr.bf16.mxu0 %v3967_v21 }
 0x5f8   :  { %3689 = vmatpush3.bf16.msra.mxu0 %v3688_v17 }
 0x5f9   :  { %3711 = vmatprep.subr.bf16.mxu0 %v3967_v21 }
 0x5fb   :  { %3126 = vmatmul.mubr.msk.f32.vlgmr.msra.gmra.mrb[38].mxu0 %vm1218_vm15, %v5570_v47  ;;  %v2845_v47 = vld [vmem:[%s6015_s8] ss:$0 sm:$0xff] }
 0x5fc   :  { %3183 = vmatprep.mubr.msk.f32.mxu0 %vm3968_vm0, %v3959_v10  ;;  %3713 = vmatpush3.bf16.msra.mxu0 %v3712_v36 }
 0x5fd   :  { %3714 = vmatprep.subr.bf16.mxu0 %v3967_v21 }
 0x600   :  { %3716 = vmatpush3.bf16.msra.mxu0 %v3715_v54 }
 0x601   :  { %3717 = vmatprep.subr.bf16.mxu0 %v3967_v21 }
 0x604   :  { %3719 = vmatpush3.bf16.msra.mxu0 %v3718_v60 }
 0x605   :  { %3720 = vmatprep.subr.bf16.mxu0 %v3967_v21 }
 0x608   :  { %3722 = vmatpush3.bf16.msra.mxu0 %v3721_v1 }
 0x609   :  { %3723 = vmatprep.subr.bf16.mxu0 %v3967_v21 }
 0x60c   :  { %3725 = vmatpush3.bf16.msra.mxu0 %v3724_v4 }
 0x60d   :  { %3181 = vmatprep.subr.mxu0 %v3959_v10 }
 0x610   :  { %3182 = vmatpush3.msk.msra.mxu0 %vm538_vm5, %v2711_v33 }
 0x63e   :  { %v2887_v23 = vpop.f32.mrb[28].mxu0 }
 0x63f   :  { %v2888_v29 = vpop.f32.mrb[29].mxu0 }
 0x640   :  { %v2889_v28 = vadd.f32 %v2888_v29, %v2887_v23 }
 0x642   :  { %v2178_v38 = vadd.f32 %v2889_v28, %v2845_v47 }
 0x657   :  { %v3062_v62 = vpop.f32.mrb[14].mxu1 }
 0x658   :  { %v3063_v26 = vpop.f32.mrb[15].mxu1 }
 0x659   :  { %v5891_v16 = vadd.f32 %v3063_v26, %v3062_v62 }
 0x65e   :  { %v2922_v27 = vpop.f32.mrb[30].mxu0 }
 0x65f   :  { %v2923_v31 = vpop.f32.mrb[31].mxu0 }
 0x660   :  { %v2924_v39 = vadd.f32 %v2923_v31, %v2922_v27  ;;  %v2849_v31 = vld [vmem:[%s6019_s12] ss:$0 sm:$0xff] }
 0x662   :  { %v2248_v41 = vadd.f32 %v2924_v39, %v2178_v38 }
 0x67e   :  { %v2957_v6 = vpop.f32.mrb[32].mxu0 }
 0x67f   :  { %v2958_v7 = vpop.f32.mrb[33].mxu0 }
 0x680   :  { %v2959_v8 = vadd.f32 %v2958_v7, %v2957_v6 }
 0x682   :  { %v2318_v24 = vadd.f32 %v2959_v8, %v2248_v41 }
 0x69e   :  { %v2992_v9 = vpop.f32.mrb[34].mxu0 }
 0x69f   :  { %v2993_v45 = vpop.f32.mrb[35].mxu0 }
 0x6a0   :  { %v2994_v35 = vadd.f32 %v2993_v45, %v2992_v9 }
 0x6a2   :  { %v2388_v46 = vadd.f32 %v2994_v35, %v2318_v24 }
 0x6be   :  { %v3027_v11 = vpop.f32.mrb[36].mxu0 }
 0x6bf   :  { %v3028_v32 = vpop.f32.mrb[37].mxu0 }
 0x6c0   :  { %v3029_v56 = vadd.f32 %v3028_v32, %v3027_v11 }
 0x6c2   :  { %v2458_v19 = vadd.f32 %v3029_v56, %v2388_v46 }
 0x6c4   :  { %v2528_v17 = vadd.f32 %v5891_v16, %v2458_v19  ;;  %v2847_v16 = vld [vmem:[%s6017_s10] ss:$0 sm:$0xff] }
 0x6ce   :  { %v2597_v23 = vpop.f32.mrb[38].mxu0 }
 0x6cf   :  { %v2598_v29 = vadd.f32 %v2597_v23, %v2528_v17  ;;  %v3127_v21 = vpop.f32.mrb[39].mxu0 }
 0x6d1   :  { %v2601_v28 = vsub.f32 0.0, %v2598_v29 }
 0x6d3   :  { %v2602_v62 = vmul.f32 1.442695, %v2601_v28 }
 0x6d5   :  { %3931 = vpow2.f32 %v2602_v62 }
 0x6df   :  { %v3932_v26 = vpop.eup %3931 }
 0x6e0   :  { %v2604_v55 = vadd.f32 1.0, %v3932_v26 }
 0x6e2   :  { %3933 = vrcp.f32 %v2604_v55 }
 0x6ec   :  { %v3934_v10 = vpop.eup %3933 }
 0x6ed   :  { %3159 = vmatmul.mubr.msk.f32.vlgmr.msra.gmra.mrb[16].mxu1 %vm525_vm8, %v3934_v10 }
 0x7c0   :  { %v2697_v47 = vpop.f32.mrb[16].mxu1 }
 0x7c1   :  { %v2698_v22 = vadd.f32 %v2847_v16, %v2697_v47  ;;  %v3160_v27 = vpop.f32.mrb[17].mxu1 }
 0x7c3   :  { %3184 = vmatmul.mubr.msk.f32.vlgmr.msra.gmra.mrb[40].mxu0 %vm2719_vm3, %v2698_v22 }
 0x896   :  { %v2792_v38 = vpop.f32.mrb[40].mxu0 }
 0x897   :  { %v2793_v39 = vadd.f32 %v2849_v31, %v2792_v38  ;;  %v3185_v51 = vpop.f32.mrb[41].mxu0 }
 0x899   :  { %2796 = vst [vmem:[#allocation2] sm:$0x3] %v2793_v39 }
 0x89a   :  { %3946 = shalt.err (!%p3943_p4)
}
 0x89b   :  { %s3947_s19 = scalar_lea.hbm %s6020_s13, 32 }
 0x89c   :  { %p3948_p5 = scmp.ne.s32.totalorder %s6020_s13, %s3947_s19  ;;  %p3951_p6 = scmp.lt.u32.totalorder %s3947_s19, %s6020_s13 }
 0x89e   :  { %p3953_p7 = pnand %p3951_p6, %p3948_p5 }
 0x8a0   :  { %3956 = shalt.err (!%p3953_p7)
}
 0x8a1   :  { %2806 = dma.vmem_to_hbm [thread:$0]  %s2804_s18, 32, %s6020_s13, [#allocation3]  }
 0x8a2   :  { %3957 = dma.done.wait [#allocation3], 32  }
 0x8a3   :  { %3958 = vsyncadd [#allocation3], 4294967264 }
 0x8a4   :  { %2810 = vsyncpa [#allocation3], 1 }

</bundles_post_ra>
